<compile_context>
chip_gen: v7x
topology: tpu7x:2x2x1
jax: 0.10.0
libtpu: 0.0.40
codegen_flags: <defaults>
</compile_context>

<pallas_src>
import math
import functools

import jax
import jax.numpy as jnp
from jax.experimental import pallas as pl
from jax.experimental.pallas import tpu as pltpu

LANE = 128
VMEM_LIMIT = 48 * 1024 * 1024
M_RESIDENT_MAX_BYTES = 8 * 1024 * 1024   # resident M (x2 buffers) stays <= 16 MiB


def _round_up(a, b):
    return ((a + b - 1) // b) * b


def _pad2(a, rows, cols):
    out = jnp.zeros((rows, cols), a.dtype)
    return out.at[: a.shape[0], : a.shape[1]].set(a)


def _pad_gates(w, rows_pad, h, h_pad):
    """(rows, 3*h) -> (rows_pad, 3*h_pad); each gate block [r|u|n] padded to h_pad."""
    rows = w.shape[0]
    out = jnp.zeros((rows_pad, 3 * h_pad), w.dtype)
    for g in range(3):
        out = out.at[:rows, g * h_pad : g * h_pad + h].set(w[:, g * h : (g + 1) * h])
    return out


# --------------------------- Kernel A: encoder --------------------------------
def _encoder_kernel(x_ref, w1_ref, b1_ref, w2_ref, b2_ref, m_ref, *, deg_col):
    # f_enc: Linear -> ReLU -> Linear -> ReLU   (bf16 MXU operands, f32 accum)
    h1 = jnp.dot(x_ref[...], w1_ref[...],
                 preferred_element_type=jnp.float32) + b1_ref[...]
    h1 = jnp.maximum(h1, 0.0)
    m = jnp.dot(h1.astype(jnp.bfloat16), w2_ref[...],
                preferred_element_type=jnp.float32) + b2_ref[...]
    m = jnp.maximum(m, 0.0)
    # Ones column in the lane padding -> A @ M accumulates in-degree for free.
    col = jax.lax.broadcasted_iota(jnp.int32, m.shape, 1)
    m = jnp.where(col == deg_col, 1.0, m)
    m_ref[...] = m.astype(jnp.bfloat16)


# ------------------- Kernel B: mean aggregation + GRU --------------------------
def _aggr_gru_kernel(adj_ref, m_ref, x_ref, z_ref,
                     wihx_ref, wihy_ref, whh_ref, bih_ref, bhh_ref,
                     out_ref, acc_ref, *, block_n, deg_col, m_resident):
    k = pl.program_id(1)

    @pl.when(k == 0)
    def _():
        acc_ref[...] = jnp.zeros_like(acc_ref)

    if m_resident:
        start = pl.multiple_of(k * block_n, block_n)
        m_tile = m_ref[pl.ds(start, block_n), :]       # VMEM-resident M, slice src tile
    else:
        m_tile = m_ref[...]                            # streamed src tile

    # A[dst_tile, src_tile] @ M[src_tile]; int8 adjacency cast to bf16 (exact).
    acc_ref[...] += jnp.dot(adj_ref[...].astype(jnp.bfloat16), m_tile,
                            preferred_element_type=jnp.float32)

    @pl.when(k == pl.num_programs(1) - 1)
    def _():
        acc = acc_ref[...]                             # (tm, msg_p) f32
        deg = acc[:, deg_col:deg_col + 1]              # in-degree (exact integers)
        inv = pl.reciprocal(jnp.maximum(deg, 1.0), approx=True)
        y = (acc * inv).astype(jnp.bfloat16)           # mean aggregation; padded cols
                                                       # hit zero rows of wih_y below
        x = x_ref[...]                                 # bf16
        z = z_ref[...]                                 # f32

        # GRUCell(concat([x, y]), z) with wih split -> no concat needed.
        gi = (jnp.dot(x, wihx_ref[...], preferred_element_type=jnp.float32)
              + jnp.dot(y, wihy_ref[...], preferred_element_type=jnp.float32)
              + bih_ref[...])
        gh = jnp.dot(z.astype(jnp.bfloat16), whh_ref[...],
                     preferred_element_type=jnp.float32) + bhh_ref[...]

        hp = out_ref.shape[1]                          # padded hidden (multiple of 128)
        i_r, i_u, i_n = gi[:, :hp], gi[:, hp:2 * hp], gi[:, 2 * hp:]
        h_r, h_u, h_n = gh[:, :hp], gh[:, hp:2 * hp], gh[:, 2 * hp:]

        r = jax.nn.sigmoid(i_r + h_r)
        u = jax.nn.sigmoid(i_u + h_u)
        n = jnp.tanh(i_n + r * h_n)
        out_ref[...] = (1.0 - u) * n + u * z           # blend kept in f32


# ------------------------------- Wrapper ---------------------------------------
@functools.partial(jax.jit, static_argnames=("block_m", "block_n"))
def continuous_message_passing(x, adj, params, z, *, block_m=512, block_n=1024):
    """x: (N, in_feats) f32, adj: (N, N) binary (any dtype; int8 preferred upstream)
    with A[dst, src], z: (N, out_feats) f32."""
    w1, b1, w2, b2, wih, bih, whh, bhh = params
    n_nodes, in_feats = x.shape
    out_feats = z.shape[1]
    hidden = w1.shape[1]
    msg = w2.shape[1]

    # Cap tiles for small graphs so the grid is not absurdly padded.
    block_m = min(block_m, _round_up(n_nodes, LANE))
    block_n = min(block_n, _round_up(n_nodes, LANE))
    block_a = block_n                      # encoder row tile (decoupled from block_m)

    in_p = _round_up(in_feats, LANE)
    hid_p = _round_up(hidden, LANE)
    msg_p = _round_up(msg + 1, LANE)       # +1 guarantees room for the degree column
    h_p = _round_up(out_feats, LANE)

    # Independent dst / src padding (no lcm inflation of the adjacency).
    n_dst_pad = _round_up(n_nodes, block_m)
    n_src_pad = _round_up(n_nodes, block_n)
    n_x_pad = _round_up(_round_up(max(n_dst_pad, n_src_pad), block_m), block_a)

    # ---- wrapper-side layout prep ---------------------------------------------
    # Adjacency: binary -> int8 is exact; single pad pass (no degree pass needed).
    adj_i8 = adj if adj.dtype == jnp.int8 else adj.astype(jnp.int8)
    if (n_dst_pad - n_nodes) or (n_src_pad - n_nodes):
        adj_i8 = jnp.pad(adj_i8, ((0, n_dst_pad - n_nodes), (0, n_src_pad - n_nodes)))

    x_b = jnp.pad(x, ((0, n_x_pad - n_nodes), (0, in_p - in_feats))).astype(jnp.bfloat16)
    z_p = jnp.pad(z, ((0, n_dst_pad - n_nodes), (0, h_p - out_feats)))

    w1_b = _pad2(w1, in_p, hid_p).astype(jnp.bfloat16)
    b1_p = _pad2(b1, 1, hid_p)
    w2_b = _pad2(w2, hid_p, msg_p).astype(jnp.bfloat16)
    b2_p = _pad2(b2, 1, msg_p)

    wihx_b = _pad_gates(wih[:in_feats, :], in_p, out_feats, h_p).astype(jnp.bfloat16)
    wihy_b = _pad_gates(wih[in_feats:, :], msg_p, out_feats, h_p).astype(jnp.bfloat16)
    whh_b = _pad_gates(whh, h_p, out_feats, h_p).astype(jnp.bfloat16)
    bih_p = _pad_gates(bih, 1, out_feats, h_p)
    bhh_p = _pad_gates(bhh, 1, out_feats, h_p)

    cparams_a = pltpu.CompilerParams(
        dimension_semantics=("parallel",),
        vmem_limit_bytes=VMEM_LIMIT)
    cparams_b = pltpu.CompilerParams(
        dimension_semantics=("parallel", "arbitrary"),
        vmem_limit_bytes=VMEM_LIMIT)

    # ---- Kernel A: per-node messages M = f_enc(x) (+ ones degree column) ------
    m_b = pl.pallas_call(
        functools.partial(_encoder_kernel, deg_col=msg),
        out_shape=jax.ShapeDtypeStruct((n_src_pad, msg_p), jnp.bfloat16),
        grid_spec=pltpu.PrefetchScalarGridSpec(
            num_scalar_prefetch=0,
            grid=(n_src_pad // block_a,),
            in_specs=[
                pl.BlockSpec((block_a, in_p), lambda i: (i, 0)),
                pl.BlockSpec((in_p, hid_p), lambda i: (0, 0)),
                pl.BlockSpec((1, hid_p), lambda i: (0, 0)),
                pl.BlockSpec((hid_p, msg_p), lambda i: (0, 0)),
                pl.BlockSpec((1, msg_p), lambda i: (0, 0)),
            ],
            out_specs=pl.BlockSpec((block_a, msg_p), lambda i: (i, 0)),
        ),
        compiler_params=cparams_a,
    )(x_b, w1_b, b1_p, w2_b, b2_p)

    # ---- Kernel B: tiled mean aggregation (A @ M) + GRU update -----------------
    # Keep M fully VMEM-resident when it is small enough (guards v7x's 64 MiB VMEM);
    # otherwise stream src tiles.
    m_resident = (n_src_pad * msg_p * 2) <= M_RESIDENT_MAX_BYTES
    if m_resident:
        m_spec = pl.BlockSpec((n_src_pad, msg_p), lambda i, k: (0, 0))
    else:
        m_spec = pl.BlockSpec((block_n, msg_p), lambda i, k: (k, 0))

    h_full = pl.pallas_call(
        functools.partial(_aggr_gru_kernel, block_n=block_n, deg_col=msg,
                          m_resident=m_resident),
        out_shape=jax.ShapeDtypeStruct((n_dst_pad, h_p), jnp.float32),
        grid_spec=pltpu.PrefetchScalarGridSpec(
            num_scalar_prefetch=0,
            grid=(n_dst_pad // block_m, n_src_pad // block_n),
            in_specs=[
                pl.BlockSpec((block_m, block_n), lambda i, k: (i, k)),   # adj (int8)
                m_spec,                                                  # messages M
                pl.BlockSpec((block_m, in_p), lambda i, k: (i, 0)),      # x dst tile
                pl.BlockSpec((block_m, h_p), lambda i, k: (i, 0)),       # z dst tile
                pl.BlockSpec((in_p, 3 * h_p), lambda i, k: (0, 0)),      # wih_x
                pl.BlockSpec((msg_p, 3 * h_p), lambda i, k: (0, 0)),     # wih_y
                pl.BlockSpec((h_p, 3 * h_p), lambda i, k: (0, 0)),       # whh
                pl.BlockSpec((1, 3 * h_p), lambda i, k: (0, 0)),         # bih
                pl.BlockSpec((1, 3 * h_p), lambda i, k: (0, 0)),         # bhh
            ],
            out_specs=pl.BlockSpec((block_m, h_p), lambda i, k: (i, 0)),
            scratch_shapes=[pltpu.VMEM((block_m, msg_p), jnp.float32)],
        ),
        compiler_params=cparams_b,
    )(adj_i8, m_b, x_b, z_p, wihx_b, wihy_b, whh_b, bih_p, bhh_p)

    h_out = h_full[:n_nodes, :out_feats]
    return h_out, h_out


# ------------------------- Pure-JAX f32 reference ------------------------------
def _reference(x, adj, params, z):
    w1, b1, w2, b2, wih, bih, whh, bhh = params
    h1 = jnp.maximum(x @ w1 + b1, 0.0)
    m = jnp.maximum(h1 @ w2 + b2, 0.0)
    deg = jnp.sum(adj, axis=1, keepdims=True)
    y = (adj @ m) / jnp.maximum(deg, 1.0)
    inp = jnp.concatenate([x, y], axis=1)
    gi = inp @ wih + bih
    gh = z @ whh + bhh
    H = z.shape[1]
    r = jax.nn.sigmoid(gi[:, :H] + gh[:, :H])
    u = jax.nn.sigmoid(gi[:, H:2 * H] + gh[:, H:2 * H])
    n = jnp.tanh(gi[:, 2 * H:] + r * gh[:, 2 * H:])
    return (1.0 - u) * n + u * z


if __name__ == "__main__":
    # Small shapes consistent with the module's constructor; N chosen so the
    # tiled grid (128-row tiles) exercises multiple dst and src tiles and the
    # cross-src accumulator.
    N = 200
    in_feats = 4
    hidden_size = 32
    msg_size = 16
    out_feats = 8

    key = jax.random.PRNGKey(0)
    keys = jax.random.split(key, 12)

    # Node features, hidden state, random sparse directed graph (A[dst, src]).
    x = jax.random.normal(keys[0], (N, in_feats), dtype=jnp.float32)
    z = jax.random.normal(keys[1], (N, out_feats), dtype=jnp.float32)
    adj = (jax.random.uniform(keys[2], (N, N)) < 0.05).astype(jnp.float32)
    adj = adj * (1.0 - jnp.eye(N, dtype=jnp.float32))  # no self loops; some isolated nodes

    # Deterministic parameter init (PyTorch-style uniform fan-in scaling),
    # stored pre-transposed as (in, out) for row-major matmuls.
    def init(k, shape, fan_in):
        bound = 1.0 / jnp.sqrt(jnp.float32(fan_in))
        return jax.random.uniform(k, shape, jnp.float32, -bound, bound)

    w1 = init(keys[3], (in_feats, hidden_size), in_feats)
    b1 = init(keys[4], (1, hidden_size), in_feats)
    w2 = init(keys[5], (hidden_size, msg_size), hidden_size)
    b2 = init(keys[6], (1, msg_size), hidden_size)

    gru_in = in_feats + msg_size
    wih = init(keys[7], (gru_in, 3 * out_feats), out_feats)
    bih = init(keys[8], (1, 3 * out_feats), out_feats)
    whh = init(keys[9], (out_feats, 3 * out_feats), out_feats)
    bhh = init(keys[10], (1, 3 * out_feats), out_feats)

    params = (w1, b1, w2, b2, wih, bih, whh, bhh)

    # Adjacency handed to the kernel as int8 (exact for binary graphs), as it
    # should be stored upstream; the f32 copy is only used by the reference.
    h_out, h_out2 = continuous_message_passing(
        x, adj.astype(jnp.int8), params, z, block_m=128, block_n=128)
    jax.block_until_ready(h_out)

    ref = _reference(x, adj, params, z)
    assert h_out.shape == (N, out_feats)
    max_err = float(jnp.max(jnp.abs(h_out - ref)))
    # bf16 MXU operands + approx reciprocal -> tolerance widened vs f32 reference.
    assert jnp.allclose(h_out, ref, atol=4e-2, rtol=4e-2), (
        f"Pallas output mismatch, max abs err = {max_err}")

    print("KERNEL_OK")
</pallas_src>

<mosaic_0001>
module attributes {stable_mosaic.version = 11 : i64} {
  func.func @_encoder_kernel(%arg0: i32, %arg1: memref<128x128xbf16, #tpu.memory_space<vmem>>, %arg2: memref<128x128xbf16, #tpu.memory_space<vmem>>, %arg3: memref<1x128xf32, #tpu.memory_space<vmem>>, %arg4: memref<128x128xbf16, #tpu.memory_space<vmem>>, %arg5: memref<1x128xf32, #tpu.memory_space<vmem>>, %arg6: memref<128x128xbf16, #tpu.memory_space<vmem>>) attributes {dimension_semantics = [#tpu.dimension_semantics<parallel>], iteration_bounds = array<i64: 2>, scalar_prefetch = 0 : i64, scratch_operands = 0 : i64, tpu.core_type = #tpu.core_type<tc>, window_params = [{transform_indices = @transform_0, window_bounds = array<i64: 128, 128>}, {pipeline_mode = #tpu.pipeline_mode<synchronous>, transform_indices = @transform_1, window_bounds = array<i64: 128, 128>}, {pipeline_mode = #tpu.pipeline_mode<synchronous>, transform_indices = @transform_2, window_bounds = array<i64: 1, 128>}, {pipeline_mode = #tpu.pipeline_mode<synchronous>, transform_indices = @transform_3, window_bounds = array<i64: 128, 128>}, {pipeline_mode = #tpu.pipeline_mode<synchronous>, transform_indices = @transform_4, window_bounds = array<i64: 1, 128>}, {transform_indices = @transform_5, window_bounds = array<i64: 128, 128>}]} {
    %c0 = arith.constant 0 : index
    %c0_0 = arith.constant 0 : index
    %0 = vector.load %arg1[%c0, %c0_0] : memref<128x128xbf16, #tpu.memory_space<vmem>>, vector<128x128xbf16>
    %c0_1 = arith.constant 0 : index
    %c0_2 = arith.constant 0 : index
    %1 = vector.load %arg2[%c0_1, %c0_2] : memref<128x128xbf16, #tpu.memory_space<vmem>>, vector<128x128xbf16>
    %cst = arith.constant dense<0.000000e+00> : vector<128x128xf32>
    %2 = tpu.matmul %0, %1, %cst {dimension_numbers = #tpu.dot_dimension_numbers<[1], [0], [0], [1], [0, 0, 1, 1], [], []>} : vector<128x128xbf16>, vector<128x128xbf16>, vector<128x128xf32> -> vector<128x128xf32>
    %c0_3 = arith.constant 0 : index
    %c0_4 = arith.constant 0 : index
    %3 = vector.load %arg3[%c0_3, %c0_4] : memref<1x128xf32, #tpu.memory_space<vmem>>, vector<1x128xf32>
    %4 = vector.broadcast %3 : vector<1x128xf32> to vector<128x128xf32>
    %5 = arith.addf %2, %4 : vector<128x128xf32>
    %cst_5 = arith.constant 0.000000e+00 : f32
    %6 = vector.broadcast %cst_5 : f32 to vector<128x128xf32>
    %7 = arith.maximumf %5, %6 : vector<128x128xf32>
    %8 = arith.truncf %7 : vector<128x128xf32> to vector<128x128xbf16>
    %c0_6 = arith.constant 0 : index
    %c0_7 = arith.constant 0 : index
    %9 = vector.load %arg4[%c0_6, %c0_7] : memref<128x128xbf16, #tpu.memory_space<vmem>>, vector<128x128xbf16>
    %cst_8 = arith.constant dense<0.000000e+00> : vector<128x128xf32>
    %10 = tpu.matmul %8, %9, %cst_8 {dimension_numbers = #tpu.dot_dimension_numbers<[1], [0], [0], [1], [0, 0, 1, 1], [], []>} : vector<128x128xbf16>, vector<128x128xbf16>, vector<128x128xf32> -> vector<128x128xf32>
    %c0_9 = arith.constant 0 : index
    %c0_10 = arith.constant 0 : index
    %11 = vector.load %arg5[%c0_9, %c0_10] : memref<1x128xf32, #tpu.memory_space<vmem>>, vector<1x128xf32>
    %12 = vector.broadcast %11 : vector<1x128xf32> to vector<128x128xf32>
    %13 = arith.addf %10, %12 : vector<128x128xf32>
    %cst_11 = arith.constant 0.000000e+00 : f32
    %14 = vector.broadcast %cst_11 : f32 to vector<128x128xf32>
    %15 = arith.maximumf %13, %14 : vector<128x128xf32>
    %16 = tpu.iota {dimensions = array<i32: 1>} : vector<128x128xi32>
    %c16_i32 = arith.constant 16 : i32
    %17 = vector.broadcast %c16_i32 : i32 to vector<128x128xi32>
    %18 = arith.cmpi eq, %16, %17 : vector<128x128xi32>
    %cst_12 = arith.constant 1.000000e+00 : f32
    %19 = vector.broadcast %cst_12 : f32 to vector<128x128xf32>
    %20 = arith.select %18, %19, %15 : vector<128x128xi1>, vector<128x128xf32>
    %21 = arith.truncf %20 : vector<128x128xf32> to vector<128x128xbf16>
    %c0_13 = arith.constant 0 : index
    %c0_14 = arith.constant 0 : index
    %22 = vector.load %arg6[%c0_13, %c0_14] : memref<128x128xbf16, #tpu.memory_space<vmem>>, vector<128x128xbf16>
    tpu.vector_store %arg6[%c0_13, %c0_14], %21 {strides = array<i32>} : memref<128x128xbf16, #tpu.memory_space<vmem>>, vector<128x128xbf16>,
    return
  }
  func.func @transform_0(%arg0: i32) -> (i32, i32) {
    %c0_i32 = arith.constant 0 : i32
    %c0_i32_0 = arith.constant 0 : i32
    return %arg0, %c0_i32 : i32, i32
  }
  func.func @transform_1(%arg0: i32) -> (i32, i32) {
    %c0_i32 = arith.constant 0 : i32
    %c0_i32_0 = arith.constant 0 : i32
    %c0_i32_1 = arith.constant 0 : i32
    return %c0_i32, %c0_i32_0 : i32, i32
  }
  func.func @transform_2(%arg0: i32) -> (i32, i32) {
    %c0_i32 = arith.constant 0 : i32
    %c0_i32_0 = arith.constant 0 : i32
    %c0_i32_1 = arith.constant 0 : i32
    return %c0_i32, %c0_i32_0 : i32, i32
  }
  func.func @transform_3(%arg0: i32) -> (i32, i32) {
    %c0_i32 = arith.constant 0 : i32
    %c0_i32_0 = arith.constant 0 : i32
    %c0_i32_1 = arith.constant 0 : i32
    return %c0_i32, %c0_i32_0 : i32, i32
  }
  func.func @transform_4(%arg0: i32) -> (i32, i32) {
    %c0_i32 = arith.constant 0 : i32
    %c0_i32_0 = arith.constant 0 : i32
    %c0_i32_1 = arith.constant 0 : i32
    return %c0_i32, %c0_i32_0 : i32, i32
  }
  func.func @transform_5(%arg0: i32) -> (i32, i32) {
    %c0_i32 = arith.constant 0 : i32
    %c0_i32_0 = arith.constant 0 : i32
    return %arg0, %c0_i32 : i32, i32
  }
}

module attributes {stable_mosaic.version = 11 : i64} {
  func.func @_aggr_gru_kernel(%arg0: i32, %arg1: i32, %arg2: memref<128x128xi8, #tpu.memory_space<vmem>>, %arg3: memref<256x128xbf16, #tpu.memory_space<vmem>>, %arg4: memref<128x128xbf16, #tpu.memory_space<vmem>>, %arg5: memref<128x128xf32, #tpu.memory_space<vmem>>, %arg6: memref<128x384xbf16, #tpu.memory_space<vmem>>, %arg7: memref<128x384xbf16, #tpu.memory_space<vmem>>, %arg8: memref<128x384xbf16, #tpu.memory_space<vmem>>, %arg9: memref<1x384xf32, #tpu.memory_space<vmem>>, %arg10: memref<1x384xf32, #tpu.memory_space<vmem>>, %arg11: memref<128x128xf32, #tpu.memory_space<vmem>>, %arg12: memref<128x128xf32, #tpu.memory_space<vmem>>) attributes {dimension_semantics = [#tpu.dimension_semantics<parallel>, #tpu.dimension_semantics<arbitrary>], iteration_bounds = array<i64: 2, 2>, scalar_prefetch = 0 : i64, scratch_operands = 1 : i64, tpu.core_type = #tpu.core_type<tc>, window_params = [{transform_indices = @transform_0, window_bounds = array<i64: 128, 128>}, {pipeline_mode = #tpu.pipeline_mode<synchronous>, transform_indices = @transform_1, window_bounds = array<i64: 256, 128>}, {transform_indices = @transform_2, window_bounds = array<i64: 128, 128>}, {transform_indices = @transform_3, window_bounds = array<i64: 128, 128>}, {pipeline_mode = #tpu.pipeline_mode<synchronous>, transform_indices = @transform_4, window_bounds = array<i64: 128, 384>}, {pipeline_mode = #tpu.pipeline_mode<synchronous>, transform_indices = @transform_5, window_bounds = array<i64: 128, 384>}, {pipeline_mode = #tpu.pipeline_mode<synchronous>, transform_indices = @transform_6, window_bounds = array<i64: 128, 384>}, {pipeline_mode = #tpu.pipeline_mode<synchronous>, transform_indices = @transform_7, window_bounds = array<i64: 1, 384>}, {pipeline_mode = #tpu.pipeline_mode<synchronous>, transform_indices = @transform_8, window_bounds = array<i64: 1, 384>}, {transform_indices = @transform_9, window_bounds = array<i64: 128, 128>}]} {
    %c0_i32 = arith.constant 0 : i32
    %0 = arith.cmpi eq, %arg1, %c0_i32 : i32
    %1 = arith.extui %0 : i1 to i32
    %c0_i32_0 = arith.constant 0 : i32
    %2 = arith.cmpi ne, %1, %c0_i32_0 : i32
    scf.if %2 {
      %cst_8 = arith.constant 0.000000e+00 : f32
      %16 = vector.broadcast %cst_8 : f32 to vector<128x128xf32>
      %c0_9 = arith.constant 0 : index
      %c0_10 = arith.constant 0 : index
      %17 = vector.load %arg12[%c0_9, %c0_10] : memref<128x128xf32, #tpu.memory_space<vmem>>, vector<128x128xf32>
      tpu.vector_store %arg12[%c0_9, %c0_10], %16 {strides = array<i32>} : memref<128x128xf32, #tpu.memory_space<vmem>>, vector<128x128xf32>,
    } else {
    }
    %c128_i32 = arith.constant 128 : i32
    %3 = arith.muli %arg1, %c128_i32 : i32
    %4 = tpu.assume_multiple %3, 128 : i32
    %5 = arith.index_cast %4 : i32 to index
    %c0 = arith.constant 0 : index
    %6 = vector.load %arg3[%5, %c0] : memref<256x128xbf16, #tpu.memory_space<vmem>>, vector<128x128xbf16>
    %c0_1 = arith.constant 0 : index
    %c0_2 = arith.constant 0 : index
    %7 = vector.load %arg12[%c0_1, %c0_2] : memref<128x128xf32, #tpu.memory_space<vmem>>, vector<128x128xf32>
    %c0_3 = arith.constant 0 : index
    %c0_4 = arith.constant 0 : index
    %8 = vector.load %arg2[%c0_3, %c0_4] : memref<128x128xi8, #tpu.memory_space<vmem>>, vector<128x128xi8>
    %9 = arith.sitofp %8 : vector<128x128xi8> to vector<128x128xbf16>
    %cst = arith.constant dense<0.000000e+00> : vector<128x128xf32>
    %10 = tpu.matmul %9, %6, %cst {dimension_numbers = #tpu.dot_dimension_numbers<[1], [0], [0], [1], [0, 0, 1, 1], [], []>} : vector<128x128xbf16>, vector<128x128xbf16>, vector<128x128xf32> -> vector<128x128xf32>
    %11 = arith.addf %7, %10 : vector<128x128xf32>
    %c0_5 = arith.constant 0 : index
    %c0_6 = arith.constant 0 : index
    %12 = vector.load %arg12[%c0_5, %c0_6] : memref<128x128xf32, #tpu.memory_space<vmem>>, vector<128x128xf32>
    tpu.vector_store %arg12[%c0_5, %c0_6], %11 {strides = array<i32>} : memref<128x128xf32, #tpu.memory_space<vmem>>, vector<128x128xf32>,
    %c1_i32 = arith.constant 1 : i32
    %13 = arith.cmpi eq, %arg1, %c1_i32 : i32
    %14 = arith.extui %13 : i1 to i32
    %c0_i32_7 = arith.constant 0 : i32
    %15 = arith.cmpi ne, %14, %c0_i32_7 : i32
    scf.if %15 {
      %c0_8 = arith.constant 0 : index
      %c0_9 = arith.constant 0 : index
      %16 = vector.load %arg12[%c0_8, %c0_9] : memref<128x128xf32, #tpu.memory_space<vmem>>, vector<128x128xf32>
      %17 = vector.extract_strided_slice %16 {offsets = [0, 16], sizes = [128, 1], strides = [1, 1]} : vector<128x128xf32> to vector<128x1xf32>
      %cst_10 = arith.constant 1.000000e+00 : f32
      %18 = vector.broadcast %cst_10 : f32 to vector<128x1xf32>
      %19 = arith.maximumf %17, %18 : vector<128x1xf32>
      %20 = tpu.reciprocal %19 {approx = true} : vector<128x1xf32> -> vector<128x1xf32>
      %21 = vector.broadcast %20 : vector<128x1xf32> to vector<128x128xf32>
      %22 = arith.mulf %16, %21 : vector<128x128xf32>
      %23 = arith.truncf %22 : vector<128x128xf32> to vector<128x128xbf16>
      %c0_11 = arith.constant 0 : index
      %c0_12 = arith.constant 0 : index
      %24 = vector.load %arg4[%c0_11, %c0_12] : memref<128x128xbf16, #tpu.memory_space<vmem>>, vector<128x128xbf16>
      %c0_13 = arith.constant 0 : index
      %c0_14 = arith.constant 0 : index
      %25 = vector.load %arg5[%c0_13, %c0_14] : memref<128x128xf32, #tpu.memory_space<vmem>>, vector<128x128xf32>
      %c0_15 = arith.constant 0 : index
      %c0_16 = arith.constant 0 : index
      %26 = vector.load %arg6[%c0_15, %c0_16] : memref<128x384xbf16, #tpu.memory_space<vmem>>, vector<128x384xbf16>
      %cst_17 = arith.constant dense<0.000000e+00> : vector<128x384xf32>
      %27 = tpu.matmul %24, %26, %cst_17 {dimension_numbers = #tpu.dot_dimension_numbers<[1], [0], [0], [1], [0, 0, 1, 1], [], []>} : vector<128x128xbf16>, vector<128x384xbf16>, vector<128x384xf32> -> vector<128x384xf32>
      %c0_18 = arith.constant 0 : index
      %c0_19 = arith.constant 0 : index
      %28 = vector.load %arg7[%c0_18, %c0_19] : memref<128x384xbf16, #tpu.memory_space<vmem>>, vector<128x384xbf16>
      %cst_20 = arith.constant dense<0.000000e+00> : vector<128x384xf32>
      %29 = tpu.matmul %23, %28, %cst_20 {dimension_numbers = #tpu.dot_dimension_numbers<[1], [0], [0], [1], [0, 0, 1, 1], [], []>} : vector<128x128xbf16>, vector<128x384xbf16>, vector<128x384xf32> -> vector<128x384xf32>
      %30 = arith.addf %27, %29 : vector<128x384xf32>
      %c0_21 = arith.constant 0 : index
      %c0_22 = arith.constant 0 : index
      %31 = vector.load %arg9[%c0_21, %c0_22] : memref<1x384xf32, #tpu.memory_space<vmem>>, vector<1x384xf32>
      %32 = vector.broadcast %31 : vector<1x384xf32> to vector<128x384xf32>
      %33 = arith.addf %30, %32 : vector<128x384xf32>
      %34 = arith.truncf %25 : vector<128x128xf32> to vector<128x128xbf16>
      %c0_23 = arith.constant 0 : index
      %c0_24 = arith.constant 0 : index
      %35 = vector.load %arg8[%c0_23, %c0_24] : memref<128x384xbf16, #tpu.memory_space<vmem>>, vector<128x384xbf16>
      %cst_25 = arith.constant dense<0.000000e+00> : vector<128x384xf32>
      %36 = tpu.matmul %34, %35, %cst_25 {dimension_numbers = #tpu.dot_dimension_numbers<[1], [0], [0], [1], [0, 0, 1, 1], [], []>} : vector<128x128xbf16>, vector<128x384xbf16>, vector<128x384xf32> -> vector<128x384xf32>
      %c0_26 = arith.constant 0 : index
      %c0_27 = arith.constant 0 : index
      %37 = vector.load %arg10[%c0_26, %c0_27] : memref<1x384xf32, #tpu.memory_space<vmem>>, vector<1x384xf32>
      %38 = vector.broadcast %37 : vector<1x384xf32> to vector<128x384xf32>
      %39 = arith.addf %36, %38 : vector<128x384xf32>
      %40 = vector.extract_strided_slice %33 {offsets = [0, 0], sizes = [128, 128], strides = [1, 1]} : vector<128x384xf32> to vector<128x128xf32>
      %41 = vector.extract_strided_slice %33 {offsets = [0, 128], sizes = [128, 128], strides = [1, 1]} : vector<128x384xf32> to vector<128x128xf32>
      %42 = vector.extract_strided_slice %33 {offsets = [0, 256], sizes = [128, 128], strides = [1, 1]} : vector<128x384xf32> to vector<128x128xf32>
      %43 = vector.extract_strided_slice %39 {offsets = [0, 0], sizes = [128, 128], strides = [1, 1]} : vector<128x384xf32> to vector<128x128xf32>
      %44 = vector.extract_strided_slice %39 {offsets = [0, 128], sizes = [128, 128], strides = [1, 1]} : vector<128x384xf32> to vector<128x128xf32>
      %45 = vector.extract_strided_slice %39 {offsets = [0, 256], sizes = [128, 128], strides = [1, 1]} : vector<128x384xf32> to vector<128x128xf32>
      %46 = arith.addf %40, %43 : vector<128x128xf32>
      %47 = arith.negf %46 : vector<128x128xf32>
      %48 = math.exp %47 : vector<128x128xf32>
      %cst_28 = arith.constant 1.000000e+00 : f32
      %49 = vector.broadcast %cst_28 : f32 to vector<128x128xf32>
      %50 = arith.addf %49, %48 : vector<128x128xf32>
      %51 = arith.divf %49, %50 : vector<128x128xf32>
      %52 = arith.addf %41, %44 : vector<128x128xf32>
      %53 = arith.negf %52 : vector<128x128xf32>
      %54 = math.exp %53 : vector<128x128xf32>
      %cst_29 = arith.constant 1.000000e+00 : f32
      %55 = vector.broadcast %cst_29 : f32 to vector<128x128xf32>
      %56 = arith.addf %55, %54 : vector<128x128xf32>
      %57 = arith.divf %55, %56 : vector<128x128xf32>
      %58 = arith.mulf %51, %45 : vector<128x128xf32>
      %59 = arith.addf %42, %58 : vector<128x128xf32>
      %60 = math.tanh %59 : vector<128x128xf32>
      %cst_30 = arith.constant 1.000000e+00 : f32
      %61 = vector.broadcast %cst_30 : f32 to vector<128x128xf32>
      %62 = arith.subf %61, %57 : vector<128x128xf32>
      %63 = arith.mulf %62, %60 : vector<128x128xf32>
      %64 = arith.mulf %57, %25 : vector<128x128xf32>
      %65 = arith.addf %63, %64 : vector<128x128xf32>
      %c0_31 = arith.constant 0 : index
      %c0_32 = arith.constant 0 : index
      %66 = vector.load %arg11[%c0_31, %c0_32] : memref<128x128xf32, #tpu.memory_space<vmem>>, vector<128x128xf32>
      tpu.vector_store %arg11[%c0_31, %c0_32], %65 {strides = array<i32>} : memref<128x128xf32, #tpu.memory_space<vmem>>, vector<128x128xf32>,
    } else {
    }
    return
  }
  func.func @transform_0(%arg0: i32, %arg1: i32) -> (i32, i32) {
    %c0_i32 = arith.constant 0 : i32
    return %arg0, %arg1 : i32, i32
  }
  func.func @transform_1(%arg0: i32, %arg1: i32) -> (i32, i32) {
    %c0_i32 = arith.constant 0 : i32
    %c0_i32_0 = arith.constant 0 : i32
    %c0_i32_1 = arith.constant 0 : i32
    return %c0_i32, %c0_i32_0 : i32, i32
  }
  func.func @transform_2(%arg0: i32, %arg1: i32) -> (i32, i32) {
    %c0_i32 = arith.constant 0 : i32
    %c0_i32_0 = arith.constant 0 : i32
    return %arg0, %c0_i32 : i32, i32
  }
  func.func @transform_3(%arg0: i32, %arg1: i32) -> (i32, i32) {
    %c0_i32 = arith.constant 0 : i32
    %c0_i32_0 = arith.constant 0 : i32
    return %arg0, %c0_i32 : i32, i32
  }
  func.func @transform_4(%arg0: i32, %arg1: i32) -> (i32, i32) {
    %c0_i32 = arith.constant 0 : i32
    %c0_i32_0 = arith.constant 0 : i32
    %c0_i32_1 = arith.constant 0 : i32
    return %c0_i32, %c0_i32_0 : i32, i32
  }
  func.func @transform_5(%arg0: i32, %arg1: i32) -> (i32, i32) {
    %c0_i32 = arith.constant 0 : i32
    %c0_i32_0 = arith.constant 0 : i32
    %c0_i32_1 = arith.constant 0 : i32
    return %c0_i32, %c0_i32_0 : i32, i32
  }
  func.func @transform_6(%arg0: i32, %arg1: i32) -> (i32, i32) {
    %c0_i32 = arith.constant 0 : i32
    %c0_i32_0 = arith.constant 0 : i32
    %c0_i32_1 = arith.constant 0 : i32
    return %c0_i32, %c0_i32_0 : i32, i32
  }
  func.func @transform_7(%arg0: i32, %arg1: i32) -> (i32, i32) {
    %c0_i32 = arith.constant 0 : i32
    %c0_i32_0 = arith.constant 0 : i32
    %c0_i32_1 = arith.constant 0 : i32
    return %c0_i32, %c0_i32_0 : i32, i32
  }
  func.func @transform_8(%arg0: i32, %arg1: i32) -> (i32, i32) {
    %c0_i32 = arith.constant 0 : i32
    %c0_i32_0 = arith.constant 0 : i32
    %c0_i32_1 = arith.constant 0 : i32
    return %c0_i32, %c0_i32_0 : i32, i32
  }
  func.func @transform_9(%arg0: i32, %arg1: i32) -> (i32, i32) {
    %c0_i32 = arith.constant 0 : i32
    %c0_i32_0 = arith.constant 0 : i32
    return %arg0, %c0_i32 : i32, i32
  }
}

</mosaic_0001>

<bundles_post_ra>
// kernel: continuous_message_passing.2
= control target key start
LH: loop header
LB: loop body
LE: loop exit
PB: predicated region body
PF: predicated region fallthrough
CT: control target
= control target key end

     0   :  { %s1106_s18 = smov 0   ;;  %s1257_s0 = inlined_call_operand.vmem [shape: bf16[256,128], index: 0, kind: input, shape index: {}]   ;;  %s1258_s1 = inlined_call_operand.vmem [shape: bf16[128,128], index: 1, kind: input, shape index: {}]   ;;  %s1259_s2 = inlined_call_operand.vmem [shape: f32[1,128], index: 2, kind: input, shape index: {}]   ;;  %s1260_s3 = inlined_call_operand.vmem [shape: bf16[128,128], index: 3, kind: input, shape index: {}]   ;;  %s1261_s4 = inlined_call_operand.vmem [shape: f32[1,128], index: 4, kind: input, shape index: {}]   ;;  %s1262_s5 = inlined_call_operand.vmem [shape: bf16[256,128], index: 5, kind: output, shape index: {}]  }
   0x1 LB: > { %s824_s19 = sadd.s32 4294967295, %s1074_s18   ;;  %p828_p0 = scmp.ge.s32.totalorder %s1074_s18, 1  ;;  %s1074_s18 = sphi %s1106_s18, %s15_s18  }
   0x2   : > { %p188_p1 = scmp.lt.s32.totalorder %s1074_s18, 3 }
   0x4   : > { %p189_p2 = pnand %p828_p0, %p188_p1 }
   0x5   : > { %v1044_v0 = vld [vmem:[%s1258_s1] sm:$0xff] (!%p189_p2)   ;;  %s829_s22 = sshll.u32 (!%p189_p2), %s824_s19, 4  ;;  %v1045_v1 = vld [vmem:[%s1258_s1 + $0x8] sm:$0xff] (!%p189_p2)   ;;  %v1046_v2 = vld [vmem:[%s1258_s1 + $0x10] sm:$0xff] (!%p189_p2)  }
   0x6   : > { %192 = sbr.rel (%p189_p2) target bundleno = 507 (0x1fb), region = 40  ;;  %p217_p3 = scmp.lt.s32.totalorder (!%p189_p2), %s829_s22, 31  ;;  %972 = vmatprep.subr.bf16.mxu0 (!%p189_p2), %v1044_v0  ;;  %v1047_v3 = vld [vmem:[%s1258_s1 + $0x18] sm:$0xff] (!%p189_p2)   ;;  %v1048_v5 = vld [vmem:[%s1258_s1 + $0x20] sm:$0xff] (!%p189_p2)   ;;  %v1049_v6 = vld [vmem:[%s1258_s1 + $0x28] sm:$0xff] (!%p189_p2)  }
   0x7   : > { %973 = vmatpush3.bf16.msra.mxu0 (!%p189_p2), %v1044_v0  ;;  %v1060_v7 = vld [vmem:[%s1260_s3] sm:$0xff] (!%p189_p2)   ;;  %v1061_v8 = vld [vmem:[%s1260_s3 + $0x8] sm:$0xff] (!%p189_p2)   ;;  %v1050_v9 = vld [vmem:[%s1258_s1 + $0x30] sm:$0xff] (!%p189_p2)  }
   0x8   : > { %974 = vmatprep.subr.bf16.mxu0 (!%p189_p2), %v1045_v1  ;;  %1004 = vmatprep.subr.bf16.mxu1 (!%p189_p2), %v1060_v7  ;;  %v1062_v10 = vld [vmem:[%s1260_s3 + $0x10] sm:$0xff] (!%p189_p2)   ;;  %v1051_v11 = vld [vmem:[%s1258_s1 + $0x38] sm:$0xff] (!%p189_p2)   ;;  %v1064_v13 = vld [vmem:[%s1260_s3 + $0x20] sm:$0xff] (!%p189_p2)  }
   0x9   : > { %1005 = vmatpush3.bf16.msra.mxu1 (!%p189_p2), %v1060_v7  ;;  %v1063_v12 = vld [vmem:[%s1260_s3 + $0x18] sm:$0xff] (!%p189_p2)   ;;  %v1065_v16 = vld [vmem:[%s1260_s3 + $0x28] sm:$0xff] (!%p189_p2)   ;;  %v1066_v22 = vld [vmem:[%s1260_s3 + $0x30] sm:$0xff] (!%p189_p2)  }
   0xa   : > { %1006 = vmatprep.subr.bf16.mxu1 (!%p189_p2), %v1061_v8  ;;  %v1067_v23 = vld [vmem:[%s1260_s3 + $0x38] sm:$0xff] (!%p189_p2)   ;;  %v833_v24 = vld [vmem:[%s1259_s2] ss:$0 sm:$0xff] (!%p189_p2) }
   0xb   : > { %975 = vmatpush3.bf16.msra.mxu0 (!%p189_p2), %v1045_v1 }
   0xc   : > { %976 = vmatprep.subr.bf16.mxu0 (!%p189_p2), %v1046_v2 }
   0xd   : > { %s1264_s22 = smov (!%p217_p3, %s829_s22), 31  ;;  %1007 = vmatpush3.bf16.msra.mxu1 %v1061_v8 }
   0xe   : > { %s830_s27 = sshll.u32 %s1264_s22, 2  ;;  %1008 = vmatprep.subr.bf16.mxu1 %v1062_v10 }
   0xf   : > { %s1131_s30 = scalar_lea.vmem %s1257_s0, %s830_s27  ;;  %977 = vmatpush3.bf16.msra.mxu0 %v1046_v2  ;;  %s1202_s16 = scalar_lea.vmem %s1262_s5, %s830_s27 }
  0x10   : > { %v1052_v4 = vld [vmem:[%s1131_s30] sm:$0xff]   ;;  %978 = vmatprep.subr.bf16.mxu0 %v1047_v3  ;;  %v1053_v14 = vld [vmem:[%s1131_s30 + $0x8] sm:$0xff]   ;;  %v1054_v15 = vld [vmem:[%s1131_s30 + $0x10] sm:$0xff]  }
  0x11   : > { %988 = vmatprep.mubr.bf16.mxu0 %v1052_v4  ;;  %1009 = vmatpush3.bf16.msra.mxu1 %v1062_v10  ;;  %v1055_v17 = vld [vmem:[%s1131_s30 + $0x18] sm:$0xff]   ;;  %v1056_v18 = vld [vmem:[%s1131_s30 + $0x20] sm:$0xff]   ;;  %v1057_v19 = vld [vmem:[%s1131_s30 + $0x28] sm:$0xff]  }
  0x12   : > { %1010 = vmatprep.subr.bf16.mxu1 %v1063_v12  ;;  %v1058_v20 = vld [vmem:[%s1131_s30 + $0x30] sm:$0xff]   ;;  %v1059_v21 = vld [vmem:[%s1131_s30 + $0x38] sm:$0xff]  }
  0x13   : > { %979 = vmatpush3.bf16.msra.mxu0 %v1047_v3 }
  0x14   : > { %980 = vmatprep.subr.bf16.mxu0 %v1048_v5 }
  0x15   : > { %1011 = vmatpush3.bf16.msra.mxu1 %v1063_v12 }
  0x16   : > { %1012 = vmatprep.subr.bf16.mxu1 %v1064_v13 }
  0x17   : > { %981 = vmatpush3.bf16.msra.mxu0 %v1048_v5 }
  0x18   : > { %982 = vmatprep.subr.bf16.mxu0 %v1049_v6 }
  0x19   : > { %1013 = vmatpush3.bf16.msra.mxu1 %v1064_v13 }
  0x1a   : > { %1014 = vmatprep.subr.bf16.mxu1 %v1065_v16 }
  0x1b   : > { %983 = vmatpush3.bf16.msra.mxu0 %v1049_v6 }
  0x1c   : > { %984 = vmatprep.subr.bf16.mxu0 %v1050_v9 }
  0x1d   : > { %1015 = vmatpush3.bf16.msra.mxu1 %v1065_v16 }
  0x1e   : > { %1016 = vmatprep.subr.bf16.mxu1 %v1066_v22 }
  0x1f   : > { %985 = vmatpush3.bf16.msra.mxu0 %v1050_v9 }
  0x20   : > { %986 = vmatprep.subr.bf16.mxu0 %v1051_v11 }
  0x21   : > { %1017 = vmatpush3.bf16.msra.mxu1 %v1066_v22 }
  0x22   : > { %1018 = vmatprep.subr.bf16.mxu1 %v1067_v23 }
  0x23   : > { %987 = vmatpush3.bf16.msra.mxu0 %v1051_v11 }
  0x25   : > { %1019 = vmatpush3.bf16.msra.mxu1 %v1067_v23 }
  0x26   : > { %989 = vmatmul.mubr.bf16.vlgmr.msra.gmra.mrb[0].mxu0 %v1053_v14 }
  0x27   : > { %992 = vmatprep.mubr.bf16.mxu0 %v1054_v15 }
  0x2e   : > { %993 = vmatmul.mubr.bf16.gmra.mrb[4].mxu0 %v1055_v17  ;;  %v669_v17 = vlaneseq }
  0x2f   : > { %996 = vmatprep.mubr.bf16.mxu0 %v1056_v18  ;;  %v1186_v18 = vld [vmem:[%s1261_s4] ss:$0 sm:$0xff] }
  0x36   : > { %997 = vmatmul.mubr.bf16.gmra.mrb[8].mxu0 %v1057_v19 }
  0x37   : > { %1000 = vmatprep.mubr.bf16.mxu0 %v1058_v20  ;;  %v1188_v20 = vand.u32 127, %v669_v17 }
  0x39   : > { %vm671_vm0 = vcmp.eq.s32.totalorder %v1188_v20, 16 }
  0x3e   : > { %1001 = vmatmul.mubr.bf16.gmra.mrb[12].mxu0 %v1059_v21 }
  0xf9   : > { %v990_v25 = vpop.f32.mrb[0].mxu0 }
  0xfa   : > { %v407_v26 = vadd.f32 %v990_v25, %v833_v24  ;;  %v398_v27 = vpop.f32.mrb[1].mxu0 }
  0xfb   : > { %v399_v28 = vadd.f32 %v833_v24, %v398_v27  ;;  %v991_v29 = vpop.f32.mrb[2].mxu0 }
  0xfc   : > { %v410_v30 = vadd.f32 %v991_v29, %v833_v24  ;;  %v401_v31 = vpop.f32.mrb[3].mxu0  ;;  %v463_v33 = vmax.f32 %v407_v26, 0.0 }
  0xfd   : > { %v402_v32 = vadd.f32 %v833_v24, %v401_v31  ;;  %v461_v35 = vmax.f32 %v399_v28, 0.0 }
  0xfe   : > { %v464_v34 = vmax.f32 %v410_v30, 0.0 }
  0xff   : > { %v462_v36 = vmax.f32 %v402_v32, 0.0 }
 0x100   : > { %v478_v37 = vpack.c.bf16 %v464_v34, %v463_v33 }
 0x101   : > { %v994_v38 = vpop.f32.mrb[4].mxu0  ;;  %v477_v39 = vpack.c.bf16 %v462_v36, %v461_v35 }
 0x102   : > { %v423_v40 = vadd.f32 %v994_v38, %v833_v24  ;;  %v414_v41 = vpop.f32.mrb[5].mxu0 }
 0x103   : > { %v415_v42 = vadd.f32 %v833_v24, %v414_v41  ;;  %v995_v43 = vpop.f32.mrb[6].mxu0  ;;  %1020 = vmatprep.mubr.bf16.mxu1 %v477_v39 }
 0x104   : > { %v426_v44 = vadd.f32 %v995_v43, %v833_v24  ;;  %v417_v45 = vpop.f32.mrb[7].mxu0  ;;  %1021 = vmatmul.mubr.bf16.vlgmr.msra.gmra.mrb[0].mxu1 %v478_v37  ;;  %v467_v47 = vmax.f32 %v423_v40, 0.0 }
 0x105   : > { %v418_v46 = vadd.f32 %v833_v24, %v417_v45  ;;  %v465_v49 = vmax.f32 %v415_v42, 0.0 }
 0x106   : > { %v468_v48 = vmax.f32 %v426_v44, 0.0 }
 0x107   : > { %v466_v50 = vmax.f32 %v418_v46, 0.0 }
 0x108   : > { %v480_v51 = vpack.c.bf16 %v468_v48, %v467_v47 }
 0x109   : > { %v479_v52 = vpack.c.bf16 %v466_v50, %v465_v49  ;;  %v998_v53 = vpop.f32.mrb[8].mxu0 }
 0x10a   : > { %v439_v54 = vadd.f32 %v998_v53, %v833_v24  ;;  %v430_v55 = vpop.f32.mrb[9].mxu0 }
 0x10b   : > { %v431_v56 = vadd.f32 %v833_v24, %v430_v55  ;;  %v999_v57 = vpop.f32.mrb[10].mxu0  ;;  %1024 = vmatprep.mubr.bf16.mxu1 %v479_v52 }
 0x10c   : > { %v442_v58 = vadd.f32 %v999_v57, %v833_v24  ;;  %v433_v59 = vpop.f32.mrb[11].mxu0  ;;  %1025 = vmatmul.mubr.bf16.gmra.mrb[4].mxu1 %v480_v51  ;;  %v471_v61 = vmax.f32 %v439_v54, 0.0 }
 0x10d   : > { %v434_v60 = vadd.f32 %v833_v24, %v433_v59  ;;  %v469_v63 = vmax.f32 %v431_v56, 0.0 }
 0x10e   : > { %v472_v62 = vmax.f32 %v442_v58, 0.0 }
 0x10f   : > { %v470_v0 = vmax.f32 %v434_v60, 0.0 }
 0x110   : > { %v482_v1 = vpack.c.bf16 %v472_v62, %v471_v61 }
 0x111   : > { %v481_v2 = vpack.c.bf16 %v470_v0, %v469_v63  ;;  %v1002_v3 = vpop.f32.mrb[12].mxu0 }
 0x112   : > { %v455_v4 = vadd.f32 %v1002_v3, %v833_v24  ;;  %v446_v5 = vpop.f32.mrb[13].mxu0 }
 0x113   : > { %v447_v6 = vadd.f32 %v833_v24, %v446_v5  ;;  %v1003_v7 = vpop.f32.mrb[14].mxu0  ;;  %1028 = vmatprep.mubr.bf16.mxu1 %v481_v2 }
 0x114   : > { %v458_v8 = vadd.f32 %v1003_v7, %v833_v24  ;;  %v449_v9 = vpop.f32.mrb[15].mxu0  ;;  %1029 = vmatmul.mubr.bf16.gmra.mrb[8].mxu1 %v482_v1  ;;  %v475_v11 = vmax.f32 %v455_v4, 0.0 }
 0x115   : > { %v450_v10 = vadd.f32 %v833_v24, %v449_v9  ;;  %v473_v13 = vmax.f32 %v447_v6, 0.0 }
 0x116   : > { %v476_v12 = vmax.f32 %v458_v8, 0.0 }
 0x117   : > { %v474_v14 = vmax.f32 %v450_v10, 0.0 }
 0x118   : > { %v484_v15 = vpack.c.bf16 %v476_v12, %v475_v11 }
 0x119   : > { %v483_v16 = vpack.c.bf16 %v474_v14, %v473_v13 }
 0x11b   : > { %1032 = vmatprep.mubr.bf16.mxu1 %v483_v16 }
 0x11c   : > { %1033 = vmatmul.mubr.bf16.gmra.mrb[12].mxu1 %v484_v15 }
 0x1d7   : > { %v1022_v19 = vpop.f32.mrb[0].mxu1 }
 0x1d8   : > { %v599_v21 = vadd.f32 %v1022_v19, %v1186_v18  ;;  %v590_v22 = vpop.f32.mrb[1].mxu1 }
 0x1d9   : > { %v591_v23 = vadd.f32 %v1186_v18, %v590_v22  ;;  %v1023_v24 = vpop.f32.mrb[2].mxu1 }
 0x1da   : > { %v655_v25 = vmax.f32 %v599_v21, 0.0  ;;  %v602_v26 = vadd.f32 %v1023_v24, %v1186_v18  ;;  %v593_v27 = vpop.f32.mrb[3].mxu1 }
 0x1db   : > { %v653_v28 = vmax.f32 %v591_v23, 0.0  ;;  %v594_v29 = vadd.f32 %v1186_v18, %v593_v27 }
 0x1dc   : > { %v656_v30 = vmax.f32 %v602_v26, 0.0  ;;  %v674_v32 = vsel %vm671_vm0, 1.0, %v655_v25 }
 0x1dd   : > { %v654_v31 = vmax.f32 %v594_v29, 0.0  ;;  %v672_v34 = vsel %vm671_vm0, 1.0, %v653_v28 }
 0x1de   : > { %v675_v33 = vsel %vm671_vm0, 1.0, %v656_v30 }
 0x1df   : > { %v901_v35 = vpack.c.bf16 %v675_v33, %v674_v32  ;;  %v673_v36 = vsel %vm671_vm0, 1.0, %v654_v31  ;;  %v1026_v37 = vpop.f32.mrb[4].mxu1 }
 0x1e0   : > { %v896_v38 = vpack.c.bf16 %v673_v36, %v672_v34  ;;  %v615_v39 = vadd.f32 %v1026_v37, %v1186_v18  ;;  %v606_v40 = vpop.f32.mrb[5].mxu1 }
 0x1e1   : > { %933 = vst [vmem:[%s1202_s16 + $0x8] sm:$0xff] %v901_v35   ;;  %v607_v41 = vadd.f32 %v1186_v18, %v606_v40  ;;  %v1027_v42 = vpop.f32.mrb[6].mxu1 }
 0x1e2   : > { %897 = vst [vmem:[%s1202_s16] sm:$0xff] %v896_v38   ;;  %v659_v43 = vmax.f32 %v615_v39, 0.0  ;;  %v618_v44 = vadd.f32 %v1027_v42, %v1186_v18  ;;  %v609_v45 = vpop.f32.mrb[7].mxu1 }
 0x1e3   : > { %v657_v46 = vmax.f32 %v607_v41, 0.0  ;;  %v610_v47 = vadd.f32 %v1186_v18, %v609_v45 }
 0x1e4   : > { %v660_v48 = vmax.f32 %v618_v44, 0.0  ;;  %v678_v50 = vsel %vm671_vm0, 1.0, %v659_v43 }
 0x1e5   : > { %v658_v49 = vmax.f32 %v610_v47, 0.0  ;;  %v676_v52 = vsel %vm671_vm0, 1.0, %v657_v46 }
 0x1e6   : > { %v679_v51 = vsel %vm671_vm0, 1.0, %v660_v48 }
 0x1e7   : > { %v911_v53 = vpack.c.bf16 %v679_v51, %v678_v50  ;;  %v677_v54 = vsel %vm671_vm0, 1.0, %v658_v49  ;;  %v1030_v55 = vpop.f32.mrb[8].mxu1 }
 0x1e8   : > { %v906_v56 = vpack.c.bf16 %v677_v54, %v676_v52  ;;  %v631_v57 = vadd.f32 %v1030_v55, %v1186_v18  ;;  %v622_v58 = vpop.f32.mrb[9].mxu1 }
 0x1e9   : > { %935 = vst [vmem:[%s1202_s16 + $0x18] sm:$0xff] %v911_v53   ;;  %v623_v59 = vadd.f32 %v1186_v18, %v622_v58  ;;  %v1031_v60 = vpop.f32.mrb[10].mxu1 }
 0x1ea   : > { %934 = vst [vmem:[%s1202_s16 + $0x10] sm:$0xff] %v906_v56   ;;  %v663_v61 = vmax.f32 %v631_v57, 0.0  ;;  %v634_v62 = vadd.f32 %v1031_v60, %v1186_v18  ;;  %v625_v63 = vpop.f32.mrb[11].mxu1 }
 0x1eb   : > { %v661_v0 = vmax.f32 %v623_v59, 0.0  ;;  %v626_v1 = vadd.f32 %v1186_v18, %v625_v63 }
 0x1ec   : > { %v664_v2 = vmax.f32 %v634_v62, 0.0  ;;  %v682_v4 = vsel %vm671_vm0, 1.0, %v663_v61 }
 0x1ed   : > { %v662_v3 = vmax.f32 %v626_v1, 0.0  ;;  %v680_v6 = vsel %vm671_vm0, 1.0, %v661_v0 }
 0x1ee   : > { %v683_v5 = vsel %vm671_vm0, 1.0, %v664_v2 }
 0x1ef   : > { %v921_v7 = vpack.c.bf16 %v683_v5, %v682_v4  ;;  %v681_v8 = vsel %vm671_vm0, 1.0, %v662_v3  ;;  %v1034_v9 = vpop.f32.mrb[12].mxu1 }
 0x1f0   : > { %v916_v10 = vpack.c.bf16 %v681_v8, %v680_v6  ;;  %v647_v11 = vadd.f32 %v1034_v9, %v1186_v18  ;;  %v638_v12 = vpop.f32.mrb[13].mxu1 }
 0x1f1   : > { %937 = vst [vmem:[%s1202_s16 + $0x28] sm:$0xff] %v921_v7   ;;  %v639_v13 = vadd.f32 %v1186_v18, %v638_v12  ;;  %v1035_v14 = vpop.f32.mrb[14].mxu1 }
 0x1f2   : > { %936 = vst [vmem:[%s1202_s16 + $0x20] sm:$0xff] %v916_v10   ;;  %v667_v15 = vmax.f32 %v647_v11, 0.0  ;;  %v650_v16 = vadd.f32 %v1035_v14, %v1186_v18  ;;  %v641_v17 = vpop.f32.mrb[15].mxu1 }
 0x1f3   : > { %v665_v19 = vmax.f32 %v639_v13, 0.0  ;;  %v642_v21 = vadd.f32 %v1186_v18, %v641_v17 }
 0x1f4   : > { %v668_v22 = vmax.f32 %v650_v16, 0.0  ;;  %v686_v24 = vsel %vm671_vm0, 1.0, %v667_v15 }
 0x1f5   : > { %v666_v23 = vmax.f32 %v642_v21, 0.0  ;;  %v684_v26 = vsel %vm671_vm0, 1.0, %v665_v19 }
 0x1f6   : > { %v687_v25 = vsel %vm671_vm0, 1.0, %v668_v22 }
 0x1f7   : > { %v931_v27 = vpack.c.bf16 %v687_v25, %v686_v24  ;;  %v685_v28 = vsel %vm671_vm0, 1.0, %v666_v23 }
 0x1f8   : > { %v926_v29 = vpack.c.bf16 %v685_v28, %v684_v26 }
 0x1f9   : > { %939 = vst [vmem:[%s1202_s16 + $0x38] sm:$0xff] %v931_v27  }
 0x1fa   : > { %938 = vst [vmem:[%s1202_s16 + $0x30] sm:$0xff] %v926_v29  }
 0x1fb PF: > { %s15_s18 = sadd.s32 1, %s1074_s18  }
 0x1fc   : > { %p12_p4 = scmp.ge.s32.totalorder %s15_s18, 4  }
 0x1fe   :  { %14 = sbr.rel (!%p12_p4) target bundleno = 1 (0x1), region = 70 }

// kernel: continuous_message_passing.3
= control target key start
LH: loop header
LB: loop body
LE: loop exit
PB: predicated region body
PF: predicated region fallthrough
CT: control target
= control target key end

     0   :  { %s4524_s0 = inlined_call_operand.vmem [shape: s8[256,256], index: 0, kind: input, shape index: {}]   ;;  %s4525_s1 = inlined_call_operand.vmem [shape: bf16[256,128], index: 1, kind: input, shape index: {}]   ;;  %s4526_s2 = inlined_call_operand.vmem [shape: bf16[256,128], index: 2, kind: input, shape index: {}]   ;;  %s4527_s3 = inlined_call_operand.vmem [shape: f32[256,128], index: 3, kind: input, shape index: {}]   ;;  %s4528_s4 = inlined_call_operand.vmem [shape: bf16[128,384], index: 4, kind: input, shape index: {}]   ;;  %s4529_s5 = inlined_call_operand.vmem [shape: bf16[128,384], index: 5, kind: input, shape index: {}]   ;;  %s4530_s6 = inlined_call_operand.vmem [shape: bf16[128,384], index: 6, kind: input, shape index: {}]   ;;  %s4531_s7 = inlined_call_operand.vmem [shape: f32[1,384], index: 7, kind: input, shape index: {}]   ;;  %s4532_s8 = inlined_call_operand.vmem [shape: f32[1,384], index: 8, kind: input, shape index: {}]   ;;  %s4533_s9 = inlined_call_operand.vmem [shape: f32[256,128], index: 9, kind: output, shape index: {}]  }
   0x1   :  { %4536 = sst [smem:[#allocation12_spill]] %s4524_s0 }
   0x2   :  { %s3572_s30 = smov 0   ;;  %s3574_s10 = smov 0  }
   0x3   :  { %s3576_s11 = smov 0   ;;  %s3578_s12 = smov 0  }
   0x4   :  { %s3580_s13 = smov 0   ;;  %s3582_s14 = smov 0  }
   0x5   :  { %s3584_s15 = smov 0  }
   0x6 LB: > { %s28_s16 = sadd.s32 1, %s3509_s13  ;;  %s31_s17 = sadd.s32 1, %s3513_s14  ;;  %s3517_s15 = sphi %s3584_s15, %s19_s15   ;;  %s3513_s14 = sphi %s3582_s14, %s4559_s14   ;;  %s3509_s13 = sphi %s3580_s13, %s4558_s13   ;;  %s3505_s12 = sphi %s3578_s12, %s4557_s12   ;;  %s3501_s11 = sphi %s3576_s11, %s4556_s11   ;;  %s3497_s10 = sphi %s3574_s10, %s4555_s10   ;;  %s3493_s30 = sphi %s3572_s30, %s4554_s30  }
   0x7   : > { %p29_p0 = scmp.ge.s32.totalorder %s28_s16, 2  ;;  %p47_p1 = scmp.ne.s32.totalorder %s3497_s10, %s3493_s30 }
   0x8   : > { %p48_p2 = scmp.eq.s32.totalorder %s3517_s15, 0  ;;  %s40_s21 = sadd.s32 1, %s3497_s10 }
   0x9   : > { %s4561_s16 = smov (%p29_p0, %s28_s16), 0  ;;  %s4563_s17 = smov (!%p29_p0, %s31_s17), %s3513_s14 }
   0xa   : > { %p49_p3 = por %p48_p2, %p47_p1  ;;  %p33_p4 = scmp.ge.s32.totalorder %s4563_s17, 2 }
   0xb   : > { %s36_s18 = ssub.s32 %s3509_s13, %s4561_s16  ;;  %p2582_p6 = scmp.ge.s32.totalorder %s3517_s15, 4 }
   0xc   : > { %s4565_s17 = smov (%p33_p4, %s4563_s17), 0 }
   0xd   : > { %4537 = sst [smem:[#allocation4_spill]] %s4565_s17  ;;  %s35_s19 = ssub.s32 %s3513_s14, %s4565_s17 }
   0xe   : > { %s37_s20 = sor.u32 %s36_s18, %s35_s19  ;;  %295 = sbr.rel (%p2582_p6) target bundleno = 33 (0x21), region = 40 }
   0xf   : > { %p38_p5 = scmp.eq.s32.totalorder %s37_s20, 0 }
  0x11   : > { %s3623_s22 = scalar_select %p38_p5, %s3497_s10, %s40_s21  }
  0x15   : > { %298 = sbr.rel (!%p49_p3) target bundleno = 33 (0x21), region = 44  ;;  %s300_s23 = sand.u32 (%p49_p3), 1, %s3497_s10  }
  0x16   : > { %s2721_s24 = sshll.u32 (%p49_p3), %s3513_s14, 3  ;;  %s2583_s25 = sshll.u32 (%p49_p3), %s300_s23, 5 }
  0x17   : > { %s305_s26 = sadd.s32 (%p49_p3), %s3509_s13, %s2721_s24  ;;  %s4538_s0 = sld [smem:[#allocation12_spill]] (%p49_p3) }
  0x18   : > { %s2586_s27 = sshll.u32 (%p49_p3), %s305_s26, 3  ;;  %s302_s19 = scalar_lea.vmem (%p49_p3), [#allocation3], %s2583_s25 }
  0x1d   : > { %s307_s18 = scalar_lea.vmem %s4538_s0, %s2586_s27 }
  0x1e   : > { %v341_v0 = vld [vmem:[%s307_s18] sm:$0xff]  ;;  %v343_v1 = vld [vmem:[%s307_s18 + $0x10] sm:$0xff] }
  0x1f   : > { %v345_v2 = vld [vmem:[%s307_s18 + $0x20] sm:$0xff]  ;;  %342 = vst [vmem:[%s302_s19] sm:$0xff] %v341_v0  ;;  %344 = vst [vmem:[%s302_s19 + $0x8] sm:$0xff] %v343_v1  ;;  %v347_v3 = vld [vmem:[%s307_s18 + $0x30] sm:$0xff] }
  0x20   : > { %346 = vst [vmem:[%s302_s19 + $0x10] sm:$0xff] %v345_v2  ;;  %348 = vst [vmem:[%s302_s19 + $0x18] sm:$0xff] %v347_v3 }
  0x21 PF: > { %p2587_p7 = scmp.ge.s32.totalorder %s3517_s15, 1  ;;  %p371_p8 = scmp.lt.s32.totalorder %s3517_s15, 5 }
  0x23   : > { %p372_p9 = pnand %p2587_p7, %p371_p8 }
  0x24   : > { %s378_s20 = sand.u32 (!%p372_p9), 1, %s3493_s30   ;;  %s2589_s21 = sshll.u32 (!%p372_p9), %s3505_s12, 4 }
  0x25   : > { %375 = sbr.rel (%p372_p9) target bundleno = 884 (0x374), region = 90  ;;  %s2588_s23 = sshll.u32 (!%p372_p9), %s378_s20, 5 }
  0x26   : > { %p425_p10 = scmp.lt.s32.totalorder (!%p372_p9), %s2589_s21, 31  ;;  %s3651_s12 = scalar_lea.vmem (!%p372_p9), [#allocation3], %s2588_s23 }
  0x27   : > { %p2595_p11 = scmp.ne.s32.totalorder (!%p372_p9), %s3501_s11, 0 }
  0x2c   : > { %s4567_s21 = smov (!%p425_p10, %s2589_s21), 31  ;;  %446 = sbr.rel (%p2595_p11) target bundleno = 54 (0x36), region = 98 }
  0x2d   : > { %s2590_s24 = sshll.u32 %s4567_s21, 2  ;;  %s2592_s25 = sshll.u32 %s4567_s21, 3  ;;  %v3519_v4 = vmov (!%p2595_p11), 0.0  }
  0x2e   : > { %s3639_s28 = scalar_lea.vmem %s4526_s2, %s2590_s24  ;;  %s3644_s19 = scalar_lea.vmem %s4527_s3, %s2592_s25  ;;  %447 = vst [vmem:[#allocation2] sm:$0xff] (!%p2595_p11), %v3519_v4  ;;  %448 = vst [vmem:[#allocation2 + $0x8] sm:$0xff] (!%p2595_p11), %v3519_v4 }
  0x2f   : > { %s3649_s30 = scalar_lea.vmem %s4533_s9, %s2592_s25  ;;  %449 = vst [vmem:[#allocation2 + $0x10] sm:$0xff] (!%p2595_p11), %v3519_v4  ;;  %450 = vst [vmem:[#allocation2 + $0x18] sm:$0xff] (!%p2595_p11), %v3519_v4 }
  0x30   : > { %451 = vst [vmem:[#allocation2 + $0x20] sm:$0xff] (!%p2595_p11), %v3519_v4  ;;  %452 = vst [vmem:[#allocation2 + $0x28] sm:$0xff] (!%p2595_p11), %v3519_v4 }
  0x31   : > { %453 = vst [vmem:[#allocation2 + $0x30] sm:$0xff] (!%p2595_p11), %v3519_v4  ;;  %454 = vst [vmem:[#allocation2 + $0x38] sm:$0xff] (!%p2595_p11), %v3519_v4 }
  0x32   : > { %455 = vst [vmem:[#allocation2 + $0x40] sm:$0xff] (!%p2595_p11), %v3519_v4  ;;  %456 = vst [vmem:[#allocation2 + $0x48] sm:$0xff] (!%p2595_p11), %v3519_v4 }
  0x33   : > { %457 = vst [vmem:[#allocation2 + $0x50] sm:$0xff] %v3519_v4  ;;  %458 = vst [vmem:[#allocation2 + $0x58] sm:$0xff] %v3519_v4 }
  0x34   : > { %459 = vst [vmem:[#allocation2 + $0x60] sm:$0xff] %v3519_v4  ;;  %460 = vst [vmem:[#allocation2 + $0x68] sm:$0xff] %v3519_v4 }
  0x35   : > { %461 = vst [vmem:[#allocation2 + $0x70] sm:$0xff] %v3519_v4  ;;  %462 = vst [vmem:[#allocation2 + $0x78] sm:$0xff] %v3519_v4 }
  0x36 PF: > { %s2596_s0 = sshll.u32 %s3501_s11, 7  ;;  %v500_v5 = vld [vmem:[%s3651_s12] sm:$0xff]  ;;  %v502_v6 = vld [vmem:[%s3651_s12 + $0x10] sm:$0xff]  ;;  %v501_v17 = vld [vmem:[%s3651_s12 + $0x8] sm:$0xff]  ;;  %p2606_p12 = scmp.ne.s32.totalorder %s3501_s11, 1 }
  0x37   : > { %s464_s17 = sshra.s32 %s2596_s0, 3  ;;  %v504_v7 = vunpack.c.l.s8.bf16 %v500_v5  ;;  %v508_v8 = vunpack.c.l.s8.bf16 %v502_v6  ;;  %v503_v18 = vld [vmem:[%s3651_s12 + $0x18] sm:$0xff]  ;;  %v505_v19 = vunpack.c.h.s8.bf16 %v500_v5  ;;  %v509_v20 = vunpack.c.h.s8.bf16 %v502_v6 }
  0x38   : > { %s2597_s20 = sshll.u32 %s464_s17, 2  ;;  %v506_v21 = vunpack.c.l.s8.bf16 %v501_v17  ;;  %v510_v22 = vunpack.c.l.s8.bf16 %v503_v18  ;;  %v507_v23 = vunpack.c.h.s8.bf16 %v501_v17  ;;  %v511_v24 = vunpack.c.h.s8.bf16 %v503_v18  ;;  %v484_v27 = vld [vmem:[#allocation2] sm:$0xff]  ;;  %v485_v37 = vld [vmem:[#allocation2 + $0x8] sm:$0xff] }
  0x39   : > { %s3660_s24 = scalar_lea.vmem %s4525_s1, %s2597_s20  ;;  %2802 = vmatprep.mubr.bf16.mxu0 %v504_v7  ;;  %2810 = vmatprep.mubr.bf16.mxu1 %v508_v8  ;;  %v486_v25 = vld [vmem:[#allocation2 + $0x10] sm:$0xff]  ;;  %v487_v31 = vld [vmem:[#allocation2 + $0x18] sm:$0xff] }
  0x3a   : > { %v3149_v9 = vld [vmem:[%s3660_s24] sm:$0xff]   ;;  %v3150_v10 = vld [vmem:[%s3660_s24 + $0x8] sm:$0xff]   ;;  %v3151_v11 = vld [vmem:[%s3660_s24 + $0x10] sm:$0xff]  }
  0x3b   : > { %2786 = vmatprep.subr.bf16.mxu0 %v3149_v9  ;;  %2914 = vmatprep.subr.bf16.mxu1 %v3149_v9  ;;  %v3152_v12 = vld [vmem:[%s3660_s24 + $0x18] sm:$0xff]   ;;  %v3153_v13 = vld [vmem:[%s3660_s24 + $0x20] sm:$0xff]   ;;  %v3154_v14 = vld [vmem:[%s3660_s24 + $0x28] sm:$0xff]  }
  0x3c   : > { %2787 = vmatpush3.bf16.msra.mxu0 %v3149_v9  ;;  %2922 = vmatpush3.bf16.msra.mxu1 %v3149_v9  ;;  %v3155_v15 = vld [vmem:[%s3660_s24 + $0x30] sm:$0xff]   ;;  %v3156_v16 = vld [vmem:[%s3660_s24 + $0x38] sm:$0xff]   ;;  %v492_v28 = vld [vmem:[#allocation2 + $0x40] sm:$0xff] }
  0x3d   : > { %2788 = vmatprep.subr.bf16.mxu0 %v3150_v10  ;;  %2915 = vmatprep.subr.bf16.mxu1 %v3150_v10  ;;  %v494_v26 = vld [vmem:[#allocation2 + $0x50] sm:$0xff]  ;;  %v495_v32 = vld [vmem:[#allocation2 + $0x58] sm:$0xff]  ;;  %v493_v38 = vld [vmem:[#allocation2 + $0x48] sm:$0xff] }
  0x3e   : > { %v490_v49 = vld [vmem:[#allocation2 + $0x30] sm:$0xff]  ;;  %v488_v51 = vld [vmem:[#allocation2 + $0x20] sm:$0xff]  ;;  %v491_v55 = vld [vmem:[#allocation2 + $0x38] sm:$0xff] }
  0x3f   : > { %v498_v50 = vld [vmem:[#allocation2 + $0x70] sm:$0xff]  ;;  %v496_v52 = vld [vmem:[#allocation2 + $0x60] sm:$0xff]  ;;  %v499_v56 = vld [vmem:[#allocation2 + $0x78] sm:$0xff] }
  0x40   : > { %2789 = vmatpush3.bf16.msra.mxu0 %v3150_v10  ;;  %2923 = vmatpush3.bf16.msra.mxu1 %v3150_v10  ;;  %v489_v61 = vld [vmem:[#allocation2 + $0x28] sm:$0xff] }
  0x41   : > { %2790 = vmatprep.subr.bf16.mxu0 %v3151_v11  ;;  %2916 = vmatprep.subr.bf16.mxu1 %v3151_v11  ;;  %v497_v62 = vld [vmem:[#allocation2 + $0x68] sm:$0xff] }
  0x44   : > { %2791 = vmatpush3.bf16.msra.mxu0 %v3151_v11  ;;  %2924 = vmatpush3.bf16.msra.mxu1 %v3151_v11 }
  0x45   : > { %2792 = vmatprep.subr.bf16.mxu0 %v3152_v12  ;;  %2917 = vmatprep.subr.bf16.mxu1 %v3152_v12 }
  0x48   : > { %2793 = vmatpush3.bf16.msra.mxu0 %v3152_v12  ;;  %2925 = vmatpush3.bf16.msra.mxu1 %v3152_v12 }
  0x49   : > { %2794 = vmatprep.subr.bf16.mxu0 %v3153_v13  ;;  %2918 = vmatprep.subr.bf16.mxu1 %v3153_v13 }
  0x4c   : > { %2795 = vmatpush3.bf16.msra.mxu0 %v3153_v13  ;;  %2926 = vmatpush3.bf16.msra.mxu1 %v3153_v13 }
  0x4d   : > { %2796 = vmatprep.subr.bf16.mxu0 %v3154_v14  ;;  %2919 = vmatprep.subr.bf16.mxu1 %v3154_v14 }
  0x50   : > { %2797 = vmatpush3.bf16.msra.mxu0 %v3154_v14  ;;  %2927 = vmatpush3.bf16.msra.mxu1 %v3154_v14 }
  0x51   : > { %2798 = vmatprep.subr.bf16.mxu0 %v3155_v15  ;;  %2920 = vmatprep.subr.bf16.mxu1 %v3155_v15 }
  0x54   : > { %2799 = vmatpush3.bf16.msra.mxu0 %v3155_v15  ;;  %2928 = vmatpush3.bf16.msra.mxu1 %v3155_v15 }
  0x55   : > { %2800 = vmatprep.subr.bf16.mxu0 %v3156_v16  ;;  %2921 = vmatprep.subr.bf16.mxu1 %v3156_v16 }
  0x58   : > { %2801 = vmatpush3.bf16.msra.mxu0 %v3156_v16  ;;  %2929 = vmatpush3.bf16.msra.mxu1 %v3156_v16 }
  0x5b   : > { %2803 = vmatmul.mubr.bf16.vlgmr.msra.gmra.mrb[0].mxu0 %v505_v19  ;;  %2811 = vmatmul.mubr.bf16.vlgmr.msra.gmra.mrb[0].mxu1 %v509_v20 }
  0x5c   : > { %2806 = vmatprep.mubr.bf16.mxu0 %v506_v21  ;;  %2814 = vmatprep.mubr.bf16.mxu1 %v510_v22 }
  0x63   : > { %2807 = vmatmul.mubr.bf16.gmra.mrb[4].mxu0 %v507_v23  ;;  %2815 = vmatmul.mubr.bf16.gmra.mrb[4].mxu1 %v511_v24 }
 0x12e   : > { %v2804_v29 = vpop.f32.mrb[0].mxu0  ;;  %v2812_v30 = vpop.f32.mrb[0].mxu1 }
 0x12f   : > { %v659_v33 = vadd.f32 %v2804_v29, %v486_v25  ;;  %v667_v34 = vadd.f32 %v2812_v30, %v494_v26  ;;  %v594_v35 = vpop.f32.mrb[1].mxu0  ;;  %v626_v36 = vpop.f32.mrb[1].mxu1 }
 0x130   : > { %v657_v39 = vadd.f32 %v594_v35, %v484_v27  ;;  %v665_v40 = vadd.f32 %v626_v36, %v492_v28  ;;  %v2805_v41 = vpop.f32.mrb[2].mxu0  ;;  %v2813_v42 = vpop.f32.mrb[2].mxu1 }
 0x131   : > { %675 = vst [vmem:[#allocation2 + $0x10] sm:$0xff] %v659_v33  ;;  %683 = vst [vmem:[#allocation2 + $0x50] sm:$0xff] %v667_v34  ;;  %v660_v43 = vadd.f32 %v2805_v41, %v487_v31  ;;  %v668_v44 = vadd.f32 %v2813_v42, %v495_v32  ;;  %v597_v45 = vpop.f32.mrb[3].mxu0  ;;  %v629_v46 = vpop.f32.mrb[3].mxu1 }
 0x132   : > { %673 = vst [vmem:[#allocation2] sm:$0xff] %v657_v39  ;;  %681 = vst [vmem:[#allocation2 + $0x40] sm:$0xff] %v665_v40  ;;  %v658_v47 = vadd.f32 %v597_v45, %v485_v37  ;;  %v666_v48 = vadd.f32 %v629_v46, %v493_v38 }
 0x133   : > { %676 = vst [vmem:[#allocation2 + $0x18] sm:$0xff] %v660_v43  ;;  %684 = vst [vmem:[#allocation2 + $0x58] sm:$0xff] %v668_v44 }
 0x134   : > { %674 = vst [vmem:[#allocation2 + $0x8] sm:$0xff] %v658_v47  ;;  %682 = vst [vmem:[#allocation2 + $0x48] sm:$0xff] %v666_v48 }
 0x136   : > { %v2808_v53 = vpop.f32.mrb[4].mxu0  ;;  %v2816_v54 = vpop.f32.mrb[4].mxu1  ;;  %692 = sbr.rel (%p2606_p12) target bundleno = 884 (0x374), region = 102 }
 0x137   : > { %v663_v57 = vadd.f32 %v2808_v53, %v490_v49  ;;  %v671_v58 = vadd.f32 %v2816_v54, %v498_v50  ;;  %v610_v59 = vpop.f32.mrb[5].mxu0  ;;  %v642_v60 = vpop.f32.mrb[5].mxu1 }
 0x138   : > { %v661_v63 = vadd.f32 %v610_v59, %v488_v51  ;;  %v669_v0 = vadd.f32 %v642_v60, %v496_v52  ;;  %v2809_v1 = vpop.f32.mrb[6].mxu0  ;;  %v2817_v2 = vpop.f32.mrb[6].mxu1 }
 0x139   : > { %679 = vst [vmem:[#allocation2 + $0x30] sm:$0xff] %v663_v57  ;;  %687 = vst [vmem:[#allocation2 + $0x70] sm:$0xff] %v671_v58  ;;  %v664_v3 = vadd.f32 %v2809_v1, %v491_v55  ;;  %v672_v4 = vadd.f32 %v2817_v2, %v499_v56  ;;  %v613_v5 = vpop.f32.mrb[7].mxu0  ;;  %v645_v6 = vpop.f32.mrb[7].mxu1 }
 0x13a   : > { %677 = vst [vmem:[#allocation2 + $0x20] sm:$0xff] %v661_v63  ;;  %685 = vst [vmem:[#allocation2 + $0x60] sm:$0xff] %v669_v0  ;;  %v662_v7 = vadd.f32 %v613_v5, %v489_v61  ;;  %v670_v8 = vadd.f32 %v645_v6, %v497_v62 }
 0x13b   : > { %680 = vst [vmem:[#allocation2 + $0x38] sm:$0xff] %v664_v3  ;;  %688 = vst [vmem:[#allocation2 + $0x78] sm:$0xff] %v672_v4 }
 0x13c   : > { %678 = vst [vmem:[#allocation2 + $0x28] sm:$0xff] %v662_v7  ;;  %686 = vst [vmem:[#allocation2 + $0x68] sm:$0xff] %v670_v8 }
 0x13d   : > { %v3673_v9 = vld [vmem:[#allocation2 + $0x10] sm:$0xff]  ;;  %v3675_v10 = vld [vmem:[#allocation2] sm:$0xff]  ;;  %v3677_v11 = vld [vmem:[#allocation2 + $0x18] sm:$0xff]  ;;  %v3520_v12 = vmov 16   ;;  %v3521_v3 = vmov 0  }
 0x13e   : > { %3158 = vset.pattern.permute.xlu1 %v3520_v12  ;;  %3157 = vset.pattern.permute.xlu0 %v3520_v12  ;;  %v711_v13 = vmax.f32 %v3673_v9, 1.0  ;;  %v709_v14 = vmax.f32 %v3675_v10, 1.0  ;;  %v712_v15 = vmax.f32 %v3677_v11, 1.0  ;;  %v3682_v16 = vld [vmem:[#allocation2 + $0x8] sm:$0xff]  ;;  %v3159_v24 = vld [vmem:[%s4529_s5 + $0x4] ss:$12 sps:$4 sm:$0xff]  }
 0x13f   : > { %v710_v17 = vmax.f32 %v3682_v16, 1.0  ;;  %v3161_v25 = vld [vmem:[%s4529_s5] ss:$12 sps:$4 sm:$0xff]   ;;  %v3162_v26 = vld [vmem:[%s4529_s5 + $0x8] ss:$12 sps:$4 sm:$0xff]   ;;  %1069 = vmatprep.subr.bf16.mxu0 %v3159_v24  ;;  %v3726_v38 = vld [vmem:[#allocation2 + $0x58] sm:$0xff]  ;;  %1101 = vmatprep.mubr.bf16.mxu0 %v3521_v3 }
 0x140   : > { %3263 = vrcp.f32 %v711_v13  ;;  %v3692_v22 = vld [vmem:[#allocation2 + $0x30] sm:$0xff]  ;;  %v3705_v28 = vld [vmem:[#allocation2 + $0x48] sm:$0xff]  ;;  %v3165_v30 = vld [vmem:[%s4529_s5 + $0x18] ss:$12 sps:$4 sm:$0xff]   ;;  %1070 = vmatpush1.bf16.msra.mxu0 %v3161_v25  ;;  %2818 = vmatprep.subr.bf16.mxu1 %v3162_v26  ;;  %v720_v48 = vmax.f32 %v3726_v38, 1.0 }
 0x141   : > { %v3687_v19 = vld [vmem:[#allocation2 + $0x20] sm:$0xff]  ;;  %3265 = vrcp.f32 %v709_v14  ;;  %v3163_v29 = vld [vmem:[%s4529_s5 + $0x1c] ss:$12 sps:$4 sm:$0xff]   ;;  %v715_v32 = vmax.f32 %v3692_v22, 1.0  ;;  %2819 = vmatpush3.bf16.msra.mxu1 %v3162_v26  ;;  %v718_v37 = vmax.f32 %v3705_v28, 1.0  ;;  %v3732_v42 = vld [vmem:[#allocation2 + $0x50] sm:$0xff] }
 0x142   : > { %v3689_v20 = vld [vmem:[#allocation2 + $0x38] sm:$0xff]  ;;  %3267 = vrcp.f32 %v712_v15  ;;  %v713_v23 = vmax.f32 %v3687_v19, 1.0  ;;  %v3166_v31 = vld [vmem:[%s4529_s5 + $0x20] ss:$12 sps:$4 sm:$0xff]   ;;  %1071 = vmatprep.subr.bf16.mxu0 %v3163_v29  ;;  %v3173_v49 = vld [vmem:[%s4529_s5 + $0x48] ss:$12 sps:$4 sm:$0xff]  }
 0x143   : > { %v3685_v18 = vld [vmem:[#allocation2 + $0x28] sm:$0xff]  ;;  %3269 = vrcp.f32 %v710_v17  ;;  %v716_v27 = vmax.f32 %v3689_v20, 1.0  ;;  %v3717_v33 = vld [vmem:[#allocation2 + $0x40] sm:$0xff]  ;;  %2820 = vmatprep.subr.bf16.mxu1 %v3166_v31  ;;  %v3169_v39 = vld [vmem:[%s4529_s5 + $0x30] ss:$12 sps:$4 sm:$0xff]   ;;  %v719_v50 = vmax.f32 %v3732_v42, 1.0 }
 0x144   : > { %v714_v21 = vmax.f32 %v3685_v18, 1.0  ;;  %v3167_v34 = vld [vmem:[%s4529_s5 + $0x34] ss:$12 sps:$4 sm:$0xff]   ;;  %v3170_v35 = vld [vmem:[%s4529_s5 + $0x38] ss:$12 sps:$4 sm:$0xff]   ;;  %1072 = vmatpush1.bf16.msra.mxu0 %v3165_v30  ;;  %v717_v41 = vmax.f32 %v3717_v33, 1.0 }
 0x145   : > { %2821 = vmatpush3.bf16.msra.mxu1 %v3166_v31  ;;  %v3734_v44 = vld [vmem:[#allocation2 + $0x68] sm:$0xff]  ;;  %1073 = vmatprep.subr.bf16.mxu0 %v3167_v34  ;;  %v3174_v47 = vld [vmem:[%s4529_s5 + $0x50] ss:$12 sps:$4 sm:$0xff]   ;;  %v3747_v51 = vld [vmem:[#allocation2 + $0x60] sm:$0xff] }
 0x146   : > { %3271 = vrcp.f32 %v714_v21  ;;  %v3171_v45 = vld [vmem:[%s4529_s5 + $0x4c] ss:$12 sps:$4 sm:$0xff]   ;;  %2822 = vmatprep.subr.bf16.mxu1 %v3170_v35  ;;  %v3175_v54 = vld [vmem:[%s4529_s5 + $0x64] ss:$12 sps:$4 sm:$0xff]   ;;  %v722_v56 = vmax.f32 %v3734_v44, 1.0  ;;  %v721_v60 = vmax.f32 %v3747_v51, 1.0 }
 0x147   : > { %3273 = vrcp.f32 %v713_v23  ;;  %v3749_v53 = vld [vmem:[#allocation2 + $0x78] sm:$0xff]  ;;  %v3755_v57 = vld [vmem:[#allocation2 + $0x70] sm:$0xff]  ;;  %v3177_v59 = vld [vmem:[%s4529_s5 + $0x60] ss:$12 sps:$4 sm:$0xff]  }
 0x148   : > { %3275 = vrcp.f32 %v716_v27  ;;  %1074 = vmatpush1.bf16.msra.mxu0 %v3169_v39  ;;  %v3178_v58 = vld [vmem:[%s4529_s5 + $0x68] ss:$12 sps:$4 sm:$0xff]   ;;  %v724_v0 = vmax.f32 %v3749_v53, 1.0  ;;  %v723_v1 = vmax.f32 %v3755_v57, 1.0  ;;  %v3182_v2 = vld [vmem:[%s4529_s5 + $0x80] ss:$12 sps:$4 sm:$0xff]  }
 0x149   : > { %3277 = vrcp.f32 %v715_v32  ;;  %2823 = vmatpush3.bf16.msra.mxu1 %v3170_v35  ;;  %1075 = vmatprep.subr.bf16.mxu0 %v3171_v45  ;;  %v3179_v62 = vld [vmem:[%s4529_s5 + $0x7c] ss:$12 sps:$4 sm:$0xff]   ;;  %v3181_v4 = vld [vmem:[%s4529_s5 + $0x78] ss:$12 sps:$4 sm:$0xff]   ;;  %v3183_v5 = vld [vmem:[%s4529_s5 + $0x94] ss:$12 sps:$4 sm:$0xff]  }
 0x14a   : > { %v3264_v36 = vpop.eup %3263  ;;  %3279 = vrcp.f32 %v718_v37  ;;  %2824 = vmatprep.subr.bf16.mxu1 %v3174_v47  ;;  %v3185_v7 = vld [vmem:[%s4529_s5 + $0x90] ss:$12 sps:$4 sm:$0xff]   ;;  %v3186_v8 = vld [vmem:[%s4529_s5 + $0x98] ss:$12 sps:$4 sm:$0xff]   ;;  %v3189_v17 = vld [vmem:[%s4529_s5 + $0xa8] ss:$12 sps:$4 sm:$0xff]  }
 0x14b   : > { %v3266_v40 = vpop.eup %3265  ;;  %753 = vperm.xlu1 %3158, %v3264_v36   ;;  %3281 = vrcp.f32 %v717_v41  ;;  %v3187_v13 = vld [vmem:[%s4529_s5 + $0xac] ss:$12 sps:$4 sm:$0xff]   ;;  %v3190_v14 = vld [vmem:[%s4529_s5 + $0xb0] ss:$12 sps:$4 sm:$0xff]   ;;  %v3194_v24 = vld [vmem:[%s4528_s4 + $0x8] ss:$12 sps:$4 sm:$0xff]  }
 0x14c   : > { %v3268_v43 = vpop.eup %3267  ;;  %743 = vperm.xlu0 %3157, %v3266_v40   ;;  %3283 = vrcp.f32 %v720_v48  ;;  %1076 = vmatpush1.bf16.msra.mxu0 %v3173_v49  ;;  %v3193_v23 = vld [vmem:[%s4528_s4 + $0x4] ss:$12 sps:$4 sm:$0xff]   ;;  %v3191_v41 = vld [vmem:[%s4528_s4] ss:$12 sps:$4 sm:$0xff]  }
 0x14d   : > { %v3270_v46 = vpop.eup %3269  ;;  %3285 = vrcp.f32 %v719_v50  ;;  %2825 = vmatpush3.bf16.msra.mxu1 %v3174_v47  ;;  %1077 = vmatprep.subr.bf16.mxu0 %v3175_v54  ;;  %v3203_v49 = vld [vmem:[%s4528_s4 + $0x34] ss:$12 sps:$4 sm:$0xff]  }
 0x14e   : > { %2826 = vmatprep.subr.bf16.mxu1 %v3178_v58  ;;  %3287 = vrcp.f32 %v722_v56 }
 0x14f   : > { %758 = vperm.xlu1 %3158, %v3268_v43   ;;  %3289 = vrcp.f32 %v721_v60  ;;  %v3200_v60 = vld [vmem:[%s4528_s4 + $0x50] ss:$12 sps:$4 sm:$0xff]  }
 0x150   : > { %v3272_v52 = vpop.eup %3271  ;;  %748 = vperm.xlu0 %3157, %v3270_v46   ;;  %1078 = vmatpush1.bf16.msra.mxu0 %v3177_v59  ;;  %3291 = vrcp.f32 %v724_v0 }
 0x151   : > { %v3274_v55 = vpop.eup %3273  ;;  %2827 = vmatpush3.bf16.msra.mxu1 %v3178_v58  ;;  %1079 = vmatprep.subr.bf16.mxu0 %v3179_v62  ;;  %3293 = vrcp.f32 %v723_v1  ;;  %v3201_v58 = vld [vmem:[%s4528_s4 + $0x30] ss:$12 sps:$4 sm:$0xff]  }
 0x152   : > { %v3276_v61 = vpop.eup %3275  ;;  %2828 = vmatprep.subr.bf16.mxu1 %v3182_v2 }
 0x153   : > { %768 = vperm.xlu1 %3158, %v3272_v52   ;;  %v3278_v63 = vpop.eup %3277  ;;  %v3199_v52 = vld [vmem:[%s4528_s4 + $0x38] ss:$12 sps:$4 sm:$0xff]  }
 0x154   : > { %763 = vperm.xlu0 %3157, %v3274_v55   ;;  %v3280_v6 = vpop.eup %3279  ;;  %1080 = vmatpush1.bf16.msra.mxu0 %v3181_v4 }
 0x155   : > { %v3282_v12 = vpop.eup %3281  ;;  %2829 = vmatpush3.bf16.msra.mxu1 %v3182_v2  ;;  %1081 = vmatprep.subr.bf16.mxu0 %v3183_v5  ;;  %v3213_v2 = vld [vmem:[%s4528_s4 + $0x64] ss:$12 sps:$4 sm:$0xff]  }
 0x156   : > { %v3284_v15 = vpop.eup %3283  ;;  %2830 = vmatprep.subr.bf16.mxu1 %v3186_v8 }
 0x157   : > { %778 = vperm.xlu1 %3158, %v3276_v61   ;;  %v3286_v21 = vpop.eup %3285 }
 0x158   : > { %773 = vperm.xlu0 %3157, %v3278_v63   ;;  %1082 = vmatpush1.bf16.msra.mxu0 %v3185_v7  ;;  %v3288_v25 = vpop.eup %3287  ;;  %v3206_v63 = vld [vmem:[%s4528_s4 + $0x48] ss:$12 sps:$4 sm:$0xff]  }
 0x159   : > { %2831 = vmatpush3.bf16.msra.mxu1 %v3186_v8  ;;  %1083 = vmatprep.subr.bf16.mxu0 %v3187_v13  ;;  %v3290_v26 = vpop.eup %3289 }
 0x15a   : > { %2832 = vmatprep.subr.bf16.mxu1 %v3190_v14  ;;  %v3292_v27 = vpop.eup %3291 }
 0x15b   : > { %788 = vperm.xlu1 %3158, %v3280_v6   ;;  %v3294_v29 = vpop.eup %3293 }
 0x15c   : > { %783 = vperm.xlu0 %3157, %v3282_v12   ;;  %1084 = vmatpush1.bf16.msra.mxu0 %v3189_v17  ;;  %v3205_v12 = vld [vmem:[%s4528_s4 + $0x80] ss:$12 sps:$4 sm:$0xff]  }
 0x15d   : > { %2833 = vmatpush3.bf16.msra.mxu1 %v3190_v14  ;;  %1455 = vmatprep.subr.bf16.mxu0 %v3193_v23  ;;  %v3235_v23 = vld [vmem:[%s4528_s4 + $0x94] ss:$12 sps:$4 sm:$0xff]  }
 0x15e   : > { %2850 = vmatprep.subr.bf16.mxu1 %v3194_v24 }
 0x15f   : > { %798 = vperm.xlu1 %3158, %v3284_v15   ;;  %v3222_v15 = vld [vmem:[%s4528_s4 + $0x78] ss:$12 sps:$4 sm:$0xff]  }
 0x160   : > { %793 = vperm.xlu0 %3157, %v3286_v21  }
 0x163   : > { %808 = vperm.xlu1 %3158, %v3288_v25  }
 0x164   : > { %803 = vperm.xlu0 %3157, %v3290_v26   ;;  %v3885_v26 = vld [vmem:[%s3639_s28] sm:$0xff]  }
 0x167   : > { %818 = vperm.xlu1 %3158, %v3292_v27   ;;  %v3233_v27 = vld [vmem:[%s4528_s4 + $0x90] ss:$12 sps:$4 sm:$0xff]  }
 0x168   : > { %813 = vperm.xlu0 %3157, %v3294_v29   ;;  %v3218_v29 = vld [vmem:[%s4530_s6 + $0x4] ss:$12 sps:$4 sm:$0xff]  }
 0x1ca   : > { %v754_v30 = vpop.permute.xlu1 %753 }
 0x1cb   : > { %v744_v31 = vpop.permute.xlu0 %743  ;;  %v823_v32 = vmul.f32 %v754_v30, %v3673_v9  ;;  %v3195_v9 = vld [vmem:[%s4528_s4 + $0x20] ss:$12 sps:$4 sm:$0xff]   ;;  %v3244_v30 = vld [vmem:[%s4528_s4 + $0xa8] ss:$12 sps:$4 sm:$0xff]  }
 0x1cc   : > { %v821_v37 = vmul.f32 %v744_v31, %v3675_v10  ;;  %v3198_v10 = vld [vmem:[%s4528_s4 + $0x1c] ss:$12 sps:$4 sm:$0xff]  }
 0x1cd   : > { %v3906_v31 = vld [vmem:[%s3639_s28 + $0x8] sm:$0xff]  }
 0x1ce   : > { %v759_v34 = vpop.permute.xlu1 %758 }
 0x1cf   : > { %v824_v35 = vmul.f32 %v759_v34, %v3677_v11  ;;  %v749_v36 = vpop.permute.xlu0 %748  ;;  %v3912_v34 = vld [vmem:[%s3639_s28 + $0x10] sm:$0xff]  }
 0x1d0   : > { %v822_v39 = vmul.f32 %v749_v36, %v3682_v16  ;;  %v3196_v16 = vld [vmem:[%s4528_s4 + $0x18] ss:$12 sps:$4 sm:$0xff]  }
 0x1d1   : > { %v838_v40 = vpack.c.bf16 %v824_v35, %v823_v32  ;;  %v3216_v32 = vld [vmem:[%s4530_s6] ss:$12 sps:$4 sm:$0xff]   ;;  %v3221_v35 = vld [vmem:[%s4530_s6 + $0x1c] ss:$12 sps:$4 sm:$0xff]   ;;  %v3219_v36 = vld [vmem:[%s4530_s6 + $0x18] ss:$12 sps:$4 sm:$0xff]  }
 0x1d2   : > { %v837_v43 = vpack.c.bf16 %v822_v39, %v821_v37  ;;  %v769_v45 = vpop.permute.xlu1 %768  ;;  %v3229_v37 = vld [vmem:[%s4530_s6 + $0x34] ss:$12 sps:$4 sm:$0xff]   ;;  %v3928_v39 = vld [vmem:[%s3639_s28 + $0x18] sm:$0xff]  }
 0x1d3   : > { %v826_v46 = vmul.f32 %v769_v45, %v3685_v18  ;;  %v764_v47 = vpop.permute.xlu0 %763  ;;  %v3950_v45 = vld [vmem:[%s4530_s6 + $0x48] ss:$12 sps:$4 sm:$0xff]  }
 0x1d4   : > { %v825_v11 = vmul.f32 %v764_v47, %v3687_v19  ;;  %1102 = vmatmul.mubr.bf16.vlgmr.msra.gmra.mrb[0].mxu0 %v837_v43  ;;  %2834 = vmatprep.mubr.bf16.mxu1 %v837_v43  ;;  %v3941_v43 = vld [vmem:[%s4530_s6 + $0x4c] ss:$12 sps:$4 sm:$0xff]  }
 0x1d5   : > { %1456 = vmatpush1.bf16.msra.mxu0 %v3191_v41  ;;  %2835 = vmatmul.mubr.bf16.vlgmr.msra.gmra.mrb[0].mxu1 %v838_v40  ;;  %v3936_v41 = vld [vmem:[%s3639_s28 + $0x20] sm:$0xff]   ;;  %v3960_v47 = vld [vmem:[%s3639_s28 + $0x28] sm:$0xff]  }
 0x1d6   : > { %v839_v18 = vpack.c.bf16 %v826_v46, %v825_v11  ;;  %2851 = vmatpush3.bf16.msra.mxu1 %v3194_v24  ;;  %v779_v48 = vpop.permute.xlu1 %778  ;;  %1111 = vmatprep.mubr.bf16.mxu0 %v3521_v3  ;;  %v3957_v46 = vld [vmem:[%s4530_s6 + $0x64] ss:$12 sps:$4 sm:$0xff]   ;;  %v3975_v11 = vld [vmem:[%s4530_s6 + $0x7c] ss:$12 sps:$4 sm:$0xff]  }
 0x1d7   : > { %v828_v50 = vmul.f32 %v779_v48, %v3689_v20  ;;  %v774_v19 = vpop.permute.xlu0 %773  ;;  %2852 = vmatprep.subr.bf16.mxu1 %v3195_v9  ;;  %1457 = vmatprep.subr.bf16.mxu0 %v3198_v10  ;;  %v3969_v10 = vld [vmem:[%s3639_s28 + $0x30] sm:$0xff]   ;;  %v3994_v48 = vld [vmem:[%s3639_s28 + $0x38] sm:$0xff]  }
 0x1d8   : > { %v827_v54 = vmul.f32 %v774_v19, %v3692_v22  ;;  %2838 = vmatprep.mubr.bf16.mxu1 %v839_v18  ;;  %v3208_v22 = vld [vmem:[%s4528_s4 + $0x4c] ss:$12 sps:$4 sm:$0xff]   ;;  %v4015_v19 = vld [vmem:[%s4530_s6 + $0xa8] ss:$12 sps:$4 sm:$0xff]  }
 0x1d9   : > { %1458 = vmatpush1.bf16.msra.mxu0 %v3196_v16  ;;  %v3984_v16 = vld [vmem:[%s4530_s6 + $0x78] ss:$12 sps:$4 sm:$0xff]  }
 0x1da   : > { %v840_v55 = vpack.c.bf16 %v828_v50, %v827_v54  ;;  %2853 = vmatpush3.bf16.msra.mxu1 %v3195_v9  ;;  %v789_v56 = vpop.permute.xlu1 %788  ;;  %1459 = vmatprep.subr.bf16.mxu0 %v3203_v49  ;;  %v3966_v9 = vld [vmem:[%s4530_s6 + $0x60] ss:$12 sps:$4 sm:$0xff]   ;;  %v4000_v49 = vld [vmem:[%s4530_s6 + $0x90] ss:$12 sps:$4 sm:$0xff]  }
 0x1db   : > { %v830_v20 = vmul.f32 %v789_v56, %v3705_v28  ;;  %v784_v59 = vpop.permute.xlu0 %783  ;;  %2854 = vmatprep.subr.bf16.mxu1 %v3199_v52  ;;  %v4006_v50 = vld [vmem:[%s4530_s6 + $0xac] ss:$12 sps:$4 sm:$0xff]  }
 0x1dc   : > { %v829_v61 = vmul.f32 %v784_v59, %v3717_v33  ;;  %1112 = vmatmul.mubr.bf16.gmra.mrb[4].mxu0 %v838_v40  ;;  %v3204_v33 = vld [vmem:[%s4528_s4 + $0x68] ss:$12 sps:$4 sm:$0xff]   ;;  %v3933_v40 = vld [vmem:[%s4530_s6 + $0x30] ss:$12 sps:$4 sm:$0xff]  }
 0x1dd   : > { %2839 = vmatmul.mubr.bf16.gmra.mrb[4].mxu1 %v840_v55  ;;  %1121 = vmatprep.mubr.bf16.mxu0 %v3521_v3  ;;  %v4022_v54 = vld [vmem:[%s3644_s19 + $0x28] sm:$0xff]  ;;  %v4043_v59 = vld [vmem:[%s3644_s19 + $0x38] sm:$0xff] }
 0x1de   : > { %v3839_v62 = vpack.c.bf16 %v830_v20, %v829_v61  ;;  %2855 = vmatpush3.bf16.msra.mxu1 %v3199_v52  ;;  %v799_v28 = vpop.permute.xlu1 %798  ;;  %1460 = vmatpush1.bf16.msra.mxu0 %v3201_v58  ;;  %v4019_v52 = vld [vmem:[%s3644_s19 + $0x20] sm:$0xff]  ;;  %v4040_v20 = vld [vmem:[%s3644_s19 + $0x30] sm:$0xff] }
 0x1df   : > { %v832_v0 = vmul.f32 %v799_v28, %v3726_v38  ;;  %v794_v1 = vpop.permute.xlu0 %793  ;;  %2856 = vmatprep.subr.bf16.mxu1 %v3200_v60  ;;  %1461 = vmatprep.subr.bf16.mxu0 %v3208_v22  ;;  %v3211_v38 = vld [vmem:[%s4528_s4 + $0x60] ss:$12 sps:$4 sm:$0xff]   ;;  %v4030_v56 = vpack.c.bf16 %v4022_v54, %v4019_v52  ;;  %v4051_v22 = vpack.c.bf16 %v4043_v59, %v4040_v20  ;;  %v3258_v61 = vld [vmem:[%s4530_s6 + $0x50] ss:$12 sps:$4 sm:$0xff]  }
 0x1e0   : > { %v831_v4 = vmul.f32 %v794_v1, %v3732_v42  ;;  %2842 = vmatprep.mubr.bf16.mxu1 %v3839_v62  ;;  %v3224_v42 = vld [vmem:[%s4528_s4 + $0x7c] ss:$12 sps:$4 sm:$0xff]   ;;  %v3256_v58 = vld [vmem:[%s4530_s6 + $0x20] ss:$12 sps:$4 sm:$0xff]  }
 0x1e1   : > { %v870_v28 = vld [vmem:[%s3644_s19 + $0x48] sm:$0xff] }
 0x1e2   : > { %v3853_v5 = vpack.c.bf16 %v832_v0, %v831_v4  ;;  %2857 = vmatpush3.bf16.msra.mxu1 %v3200_v60  ;;  %v809_v6 = vpop.permute.xlu1 %808  ;;  %1462 = vmatpush1.bf16.msra.mxu0 %v3206_v63  ;;  %v3257_v60 = vld [vmem:[%s4530_s6 + $0x38] ss:$12 sps:$4 sm:$0xff]   ;;  %v3259_v63 = vld [vmem:[%s4530_s6 + $0x68] ss:$12 sps:$4 sm:$0xff]   ;;  %v3260_v1 = vld [vmem:[%s4530_s6 + $0x80] ss:$12 sps:$4 sm:$0xff]  }
 0x1e3   : > { %v834_v7 = vmul.f32 %v809_v6, %v3734_v44  ;;  %v804_v8 = vpop.permute.xlu0 %803  ;;  %2858 = vmatprep.subr.bf16.mxu1 %v3204_v33  ;;  %1463 = vmatprep.subr.bf16.mxu0 %v3213_v2  ;;  %v4082_v2 = vld [vmem:[%s3644_s19 + $0x58] sm:$0xff] }
 0x1e4   : > { %v833_v13 = vmul.f32 %v804_v8, %v3747_v51  ;;  %1122 = vmatmul.mubr.bf16.gmra.mrb[8].mxu0 %v839_v18  ;;  %v3209_v51 = vld [vmem:[%s4528_s4 + $0x98] ss:$12 sps:$4 sm:$0xff]   ;;  %v3991_v18 = vld [vmem:[%s4530_s6 + $0x94] ss:$12 sps:$4 sm:$0xff]   ;;  %v3262_v6 = vld [vmem:[%s4530_s6 + $0xb0] ss:$12 sps:$4 sm:$0xff]  }
 0x1e5   : > { %2843 = vmatmul.mubr.bf16.gmra.mrb[8].mxu1 %v3853_v5  ;;  %1131 = vmatprep.mubr.bf16.mxu0 %v3521_v3  ;;  %v3261_v4 = vld [vmem:[%s4530_s6 + $0x98] ss:$12 sps:$4 sm:$0xff]  }
 0x1e6   : > { %v3868_v44 = vpack.c.bf16 %v834_v7, %v833_v13  ;;  %2859 = vmatpush3.bf16.msra.mxu1 %v3204_v33  ;;  %v819_v14 = vpop.permute.xlu1 %818  ;;  %1464 = vmatpush1.bf16.msra.mxu0 %v3211_v38  ;;  %v4079_v33 = vld [vmem:[%s3644_s19 + $0x50] sm:$0xff]  ;;  %v873_v38 = vld [vmem:[%s3644_s19 + $0x60] sm:$0xff]  ;;  %v874_v7 = vld [vmem:[%s3644_s19 + $0x68] sm:$0xff] }
 0x1e7   : > { %v836_v17 = vmul.f32 %v819_v14, %v3749_v53  ;;  %v814_v21 = vpop.permute.xlu0 %813  ;;  %2860 = vmatprep.subr.bf16.mxu1 %v3205_v12  ;;  %1465 = vmatprep.subr.bf16.mxu0 %v3224_v42  ;;  %v3210_v53 = vld [vmem:[%s4528_s4 + $0xb0] ss:$12 sps:$4 sm:$0xff]   ;;  %v1736_v8 = vpack.c.bf16 %v874_v7, %v873_v38  ;;  %v861_v13 = vld [vmem:[%s3644_s19] sm:$0xff] }
 0x1e8   : > { %v835_v24 = vmul.f32 %v814_v21, %v3755_v57  ;;  %2846 = vmatprep.mubr.bf16.mxu1 %v3868_v44  ;;  %v3246_v57 = vld [vmem:[%s4528_s4 + $0xac] ss:$12 sps:$4 sm:$0xff]  }
 0x1e9   : > { %v876_v42 = vld [vmem:[%s3644_s19 + $0x78] sm:$0xff] }
 0x1ea   : > { %v3882_v25 = vpack.c.bf16 %v836_v17, %v835_v24  ;;  %2861 = vmatpush3.bf16.msra.mxu1 %v3205_v12  ;;  %1466 = vmatpush1.bf16.msra.mxu0 %v3222_v15  ;;  %v4108_v12 = vld [vmem:[%s3644_s19 + $0x70] sm:$0xff]  ;;  %v864_v21 = vld [vmem:[%s3644_s19 + $0x18] sm:$0xff] }
 0x1eb   : > { %2862 = vmatprep.subr.bf16.mxu1 %v3209_v51  ;;  %1467 = vmatprep.subr.bf16.mxu0 %v3235_v23  ;;  %4539 = vst [vmem:[#allocation5_spill] sm:$0xff] %v4108_v12  ;;  %v1737_v14 = vpack.c.bf16 %v876_v42, %v4108_v12  ;;  %v863_v17 = vld [vmem:[%s3644_s19 + $0x10] sm:$0xff] }
 0x1ec   : > { %1132 = vmatmul.mubr.bf16.gmra.mrb[12].mxu0 %v840_v55  ;;  %v3255_v55 = vld [vmem:[%s4530_s6 + $0x8] ss:$12 sps:$4 sm:$0xff]  }
 0x1ed   : > { %2847 = vmatmul.mubr.bf16.gmra.mrb[12].mxu1 %v3882_v25  ;;  %1141 = vmatprep.mubr.bf16.mxu0 %v3521_v3 }
 0x1ee   : > { %2863 = vmatpush3.bf16.msra.mxu1 %v3209_v51  ;;  %2866 = vmatprep.mubr.bf16.mxu1 %v3885_v26  ;;  %v1731_v51 = vpack.c.bf16 %v864_v21, %v863_v17 }
 0x1ef   : > { %2864 = vmatprep.subr.bf16.mxu1 %v3210_v53  ;;  %1468 = vmatpush1.bf16.msra.mxu0 %v3233_v27 }
 0x1f0   : > { %1469 = vmatprep.subr.bf16.mxu0 %v3246_v57 }
 0x1f2   : > { %2865 = vmatpush3.bf16.msra.mxu1 %v3210_v53 }
 0x1f3   : > { %2930 = vmatprep.subr.bf16.mxu1 %v3218_v29  ;;  %1470 = vmatpush1.bf16.msra.mxu0 %v3244_v30 }
 0x1f4   : > { %1142 = vmatmul.mubr.bf16.gmra.mrb[16].mxu0 %v3839_v62  ;;  %1915 = vmatprep.subr.bf16.mxu0 %v3218_v29  ;;  %v4062_v62 = vld [vmem:[%s3644_s19 + $0x40] sm:$0xff] }
 0x1f5   : > { %2867 = vmatmul.mubr.bf16.vlgmr.msra.gmra.mrb[0].mxu1 %v3906_v31  ;;  %1151 = vmatprep.mubr.bf16.mxu0 %v3521_v3  ;;  %v1734_v0 = vpack.c.bf16 %v870_v28, %v4062_v62 }
 0x1f6   : > { %2938 = vmatpush1.bf16.msra.mxu1 %v3216_v32  ;;  %2870 = vmatprep.mubr.bf16.mxu1 %v3912_v34 }
 0x1f7   : > { %2931 = vmatprep.subr.bf16.mxu1 %v3221_v35 }
 0x1fa   : > { %2939 = vmatpush1.bf16.msra.mxu1 %v3219_v36 }
 0x1fb   : > { %2932 = vmatprep.subr.bf16.mxu1 %v3229_v37 }
 0x1fc   : > { %1152 = vmatmul.mubr.bf16.gmra.mrb[20].mxu0 %v3853_v5  ;;  %v1735_v5 = vpack.c.bf16 %v4082_v2, %v4079_v33 }
 0x1fd   : > { %2871 = vmatmul.mubr.bf16.gmra.mrb[4].mxu1 %v3928_v39  ;;  %1161 = vmatprep.mubr.bf16.mxu0 %v3521_v3 }
 0x1fe   : > { %2940 = vmatpush1.bf16.msra.mxu1 %v3933_v40  ;;  %2874 = vmatprep.mubr.bf16.mxu1 %v3936_v41 }
 0x1ff   : > { %2933 = vmatprep.subr.bf16.mxu1 %v3941_v43 }
 0x202   : > { %2941 = vmatpush1.bf16.msra.mxu1 %v3950_v45 }
 0x203   : > { %2934 = vmatprep.subr.bf16.mxu1 %v3957_v46 }
 0x204   : > { %1162 = vmatmul.mubr.bf16.gmra.mrb[24].mxu0 %v3868_v44  ;;  %v862_v44 = vld [vmem:[%s3644_s19 + $0x8] sm:$0xff] }
 0x205   : > { %2875 = vmatmul.mubr.bf16.gmra.mrb[8].mxu1 %v3960_v47  ;;  %1171 = vmatprep.mubr.bf16.mxu0 %v3521_v3  ;;  %v1730_v15 = vpack.c.bf16 %v862_v44, %v861_v13 }
 0x206   : > { %2942 = vmatpush1.bf16.msra.mxu1 %v3966_v9  ;;  %2878 = vmatprep.mubr.bf16.mxu1 %v3969_v10 }
 0x207   : > { %2935 = vmatprep.subr.bf16.mxu1 %v3975_v11 }
 0x20a   : > { %2943 = vmatpush1.bf16.msra.mxu1 %v3984_v16 }
 0x20b   : > { %2936 = vmatprep.subr.bf16.mxu1 %v3991_v18 }
 0x20c   : > { %1172 = vmatmul.mubr.bf16.gmra.mrb[28].mxu0 %v3882_v25 }
 0x20d   : > { %2879 = vmatmul.mubr.bf16.gmra.mrb[12].mxu1 %v3994_v48  ;;  %1487 = vmatprep.mubr.bf16.mxu0 %v3521_v3 }
 0x20e   : > { %2944 = vmatpush1.bf16.msra.mxu1 %v4000_v49  ;;  %1967 = vmatprep.mubr.bf16.mxu1 %v3521_v3 }
 0x20f   : > { %2937 = vmatprep.subr.bf16.mxu1 %v4006_v50 }
 0x212   : > { %2945 = vmatpush1.bf16.msra.mxu1 %v4015_v19 }
 0x213   : > { %2882 = vmatprep.subr.bf16.mxu1 %v3255_v55 }
 0x214   : > { %1488 = vmatmul.mubr.bf16.vlgmr.msra.gmra.mrb[0].mxu0 %v3885_v26 }
 0x215   : > { %1916 = vmatpush1.bf16.msra.mxu0 %v3216_v32  ;;  %1968 = vmatmul.mubr.bf16.vlgmr.msra.gmra.mrb[16].mxu1 %v4030_v56 }
 0x216   : > { %1497 = vmatprep.mubr.bf16.mxu0 %v3521_v3  ;;  %1917 = vmatprep.subr.bf16.mxu0 %v3221_v35 }
 0x217   : > { %1977 = vmatprep.mubr.bf16.mxu1 %v3521_v3  ;;  %2883 = vmatpush3.bf16.msra.mxu1 %v3255_v55 }
 0x218   : > { %2884 = vmatprep.subr.bf16.mxu1 %v3256_v58 }
 0x219   : > { %1918 = vmatpush1.bf16.msra.mxu0 %v3219_v36 }
 0x21a   : > { %1919 = vmatprep.subr.bf16.mxu0 %v3229_v37 }
 0x21b   : > { %2885 = vmatpush3.bf16.msra.mxu1 %v3256_v58 }
 0x21c   : > { %1498 = vmatmul.mubr.bf16.gmra.mrb[4].mxu0 %v3906_v31  ;;  %2886 = vmatprep.subr.bf16.mxu1 %v3257_v60 }
 0x21d   : > { %1978 = vmatmul.mubr.bf16.gmra.mrb[20].mxu1 %v4051_v22  ;;  %1507 = vmatprep.mubr.bf16.mxu0 %v3521_v3 }
 0x21e   : > { %1920 = vmatpush1.bf16.msra.mxu0 %v3933_v40  ;;  %1987 = vmatprep.mubr.bf16.mxu1 %v3521_v3 }
 0x21f   : > { %1921 = vmatprep.subr.bf16.mxu0 %v3941_v43  ;;  %2887 = vmatpush3.bf16.msra.mxu1 %v3257_v60 }
 0x220   : > { %2888 = vmatprep.subr.bf16.mxu1 %v3258_v61 }
 0x222   : > { %1922 = vmatpush1.bf16.msra.mxu0 %v3950_v45 }
 0x223   : > { %2889 = vmatpush3.bf16.msra.mxu1 %v3258_v61  ;;  %1923 = vmatprep.subr.bf16.mxu0 %v3957_v46 }
 0x224   : > { %1508 = vmatmul.mubr.bf16.gmra.mrb[8].mxu0 %v3912_v34  ;;  %2890 = vmatprep.subr.bf16.mxu1 %v3259_v63 }
 0x225   : > { %1988 = vmatmul.mubr.bf16.gmra.mrb[24].mxu1 %v1734_v0  ;;  %1517 = vmatprep.mubr.bf16.mxu0 %v3521_v3 }
 0x226   : > { %1997 = vmatprep.mubr.bf16.mxu1 %v3521_v3  ;;  %1924 = vmatpush1.bf16.msra.mxu0 %v3966_v9 }
 0x227   : > { %2891 = vmatpush3.bf16.msra.mxu1 %v3259_v63  ;;  %1925 = vmatprep.subr.bf16.mxu0 %v3975_v11 }
 0x228   : > { %2892 = vmatprep.subr.bf16.mxu1 %v3260_v1 }
 0x22a   : > { %1926 = vmatpush1.bf16.msra.mxu0 %v3984_v16 }
 0x22b   : > { %2893 = vmatpush3.bf16.msra.mxu1 %v3260_v1  ;;  %1927 = vmatprep.subr.bf16.mxu0 %v3991_v18  ;;  %v4164_v18 = vld [vmem:[%s4531_s7] sm:$0x7] }
 0x22c   : > { %1518 = vmatmul.mubr.bf16.gmra.mrb[12].mxu0 %v3928_v39  ;;  %2894 = vmatprep.subr.bf16.mxu1 %v3261_v4 }
 0x22d   : > { %1998 = vmatmul.mubr.bf16.gmra.mrb[28].mxu1 %v1735_v5  ;;  %1527 = vmatprep.mubr.bf16.mxu0 %v3521_v3 }
 0x22e   : > { %2007 = vmatprep.mubr.bf16.mxu1 %v3521_v3  ;;  %1928 = vmatpush1.bf16.msra.mxu0 %v4000_v49 }
 0x22f   : > { %2895 = vmatpush3.bf16.msra.mxu1 %v3261_v4  ;;  %1929 = vmatprep.subr.bf16.mxu0 %v4006_v50 }
 0x230   : > { %2896 = vmatprep.subr.bf16.mxu1 %v3262_v6 }
 0x232   : > { %1930 = vmatpush1.bf16.msra.mxu0 %v4015_v19 }
 0x233   : > { %2897 = vmatpush3.bf16.msra.mxu1 %v3262_v6 }
 0x234   : > { %1528 = vmatmul.mubr.bf16.gmra.mrb[16].mxu0 %v3936_v41  ;;  %v1667_v41 = vlaneseq }
 0x235   : > { %2008 = vmatmul.mubr.bf16.gmra.mrb[32].mxu1 %v1736_v8  ;;  %1537 = vmatprep.mubr.bf16.mxu0 %v3521_v3 }
 0x236   : > { %2017 = vmatprep.mubr.bf16.mxu1 %v3521_v3  ;;  %v4157_v46 = vshrl.u32 %v1667_v41, 7 }
 0x23c   : > { %1538 = vmatmul.mubr.bf16.gmra.mrb[20].mxu0 %v3960_v47  ;;  %v1669_v47 = vsub.s32 0, %v4157_v46 }
 0x23d   : > { %2018 = vmatmul.mubr.bf16.gmra.mrb[36].mxu1 %v1737_v14  ;;  %1547 = vmatprep.mubr.bf16.mxu0 %v3521_v3 }
 0x23e   : > { %2898 = vmatprep.mubr.bf16.mxu1 %v1730_v15  ;;  %v4172_v50 = vrot.slane %v4164_v18, %v1669_v47 }
 0x244   : > { %1548 = vmatmul.mubr.bf16.gmra.mrb[24].mxu0 %v3969_v10  ;;  %v1673_v10 = vsub.s32 1, %v4157_v46 }
 0x245   : > { %2899 = vmatmul.mubr.bf16.vlgmr.msra.gmra.mrb[40].mxu1 %v1731_v51  ;;  %1557 = vmatprep.mubr.bf16.mxu0 %v3521_v3 }
 0x246   : > { %2902 = vmatprep.mubr.bf16.mxu1 %v4030_v56  ;;  %v4175_v19 = vrot.slane %v4164_v18, %v1673_v10 }
 0x24c   : > { %1558 = vmatmul.mubr.bf16.gmra.mrb[28].mxu0 %v3994_v48  ;;  %v4169_v48 = vld [vmem:[%s4532_s8] sm:$0x7] }
 0x24d   : > { %2903 = vmatmul.mubr.bf16.gmra.mrb[44].mxu1 %v4051_v22  ;;  %1947 = vmatprep.mubr.bf16.mxu0 %v3521_v3  ;;  %v4178_v55 = vrot.slane %v4169_v48, %v1669_v47  ;;  %v4181_v58 = vrot.slane %v4169_v48, %v1673_v10 }
 0x24e   : > { %2906 = vmatprep.mubr.bf16.mxu1 %v1734_v0 }
 0x254   : > { %1948 = vmatmul.mubr.bf16.vlgmr.msra.gmra.mrb[0].mxu0 %v1730_v15 }
 0x255   : > { %2907 = vmatmul.mubr.bf16.gmra.mrb[48].mxu1 %v1735_v5  ;;  %1957 = vmatprep.mubr.bf16.mxu0 %v3521_v3 }
 0x256   : > { %2910 = vmatprep.mubr.bf16.mxu1 %v1736_v8 }
 0x25c   : > { %1958 = vmatmul.mubr.bf16.gmra.mrb[4].mxu0 %v1731_v51 }
 0x25d   : > { %2911 = vmatmul.mubr.bf16.gmra.mrb[52].mxu1 %v1737_v14 }
 0x2c8   : > { %v4125_v23 = vpop.f32.mrb[0].mxu1 }
 0x2c9   : > { %4540 = vst [vmem:[#allocation6_spill] sm:$0xff] %v4125_v23  ;;  %v4127_v24 = vpop.f32.mrb[1].mxu1 }
 0x2ca   : > { %v4129_v25 = vpop.f32.mrb[2].mxu1 }
 0x2cb   : > { %4541 = vst [vmem:[#allocation7_spill] sm:$0xff] %v4129_v25  ;;  %v4131_v26 = vpop.f32.mrb[3].mxu1 }
 0x2cc   : > { %4542 = vst [vmem:[#allocation8_spill] sm:$0xff] %v4131_v26 }
 0x2d0   : > { %v4133_v53 = vpop.f32.mrb[4].mxu1 }
 0x2d1   : > { %v4135_v27 = vpop.f32.mrb[5].mxu1 }
 0x2d2   : > { %v4137_v57 = vpop.f32.mrb[6].mxu1 }
 0x2d3   : > { %v4139_v29 = vpop.f32.mrb[7].mxu1 }
 0x2d8   : > { %v4141_v3 = vpop.f32.mrb[8].mxu1 }
 0x2d9   : > { %v4143_v30 = vpop.f32.mrb[9].mxu1 }
 0x2da   : > { %v4145_v31 = vpop.f32.mrb[10].mxu1 }
 0x2db   : > { %v4147_v32 = vpop.f32.mrb[11].mxu1 }
 0x2e0   : > { %v4149_v34 = vpop.f32.mrb[12].mxu1 }
 0x2e1   : > { %v4151_v35 = vpop.f32.mrb[13].mxu1 }
 0x2e2   : > { %v4153_v36 = vpop.f32.mrb[14].mxu1 }
 0x2e3   : > { %v4155_v37 = vpop.f32.mrb[15].mxu1 }
 0x2e8   : > { %v1969_v39 = vpop.f32.mrb[16].mxu1 }
 0x2e9   : > { %v1971_v40 = vpop.f32.mrb[17].mxu1 }
 0x2ea   : > { %v1973_v43 = vpop.f32.mrb[18].mxu1 }
 0x2eb   : > { %v1975_v45 = vpop.f32.mrb[19].mxu1 }
 0x2f0   : > { %v1979_v9 = vpop.f32.mrb[20].mxu1 }
 0x2f1   : > { %v1981_v11 = vpop.f32.mrb[21].mxu1 }
 0x2f2   : > { %v1983_v16 = vpop.f32.mrb[22].mxu1 }
 0x2f3   : > { %v1985_v49 = vpop.f32.mrb[23].mxu1 }
 0x2f7   : > { %v1509_v56 = vpop.f32.mrb[8].mxu0 }
 0x2f8   : > { %v2962_v60 = vadd.f32 %v4172_v50, %v1509_v56  ;;  %v1511_v22 = vpop.f32.mrb[9].mxu0  ;;  %v4184_v61 = vpop.f32.mrb[24].mxu1 }
 0x2f9   : > { %v2965_v28 = vadd.f32 %v4175_v19, %v1511_v22  ;;  %v1513_v63 = vpop.f32.mrb[10].mxu0  ;;  %v4187_v0 = vpop.f32.mrb[25].mxu1 }
 0x2fa   : > { %v2968_v1 = vadd.f32 %v4172_v50, %v1513_v63  ;;  %v1515_v4 = vpop.f32.mrb[11].mxu0  ;;  %v2963_v5 = vadd.f32 %v2962_v60, %v4178_v55  ;;  %v4191_v6 = vpop.f32.mrb[26].mxu1 }
 0x2fb   : > { %v2971_v38 = vadd.f32 %v4175_v19, %v1515_v4  ;;  %v2966_v7 = vadd.f32 %v2965_v28, %v4181_v58  ;;  %v4195_v8 = vpop.f32.mrb[27].mxu1 }
 0x2fc   : > { %v2964_v42 = vadd.f32 %v2963_v5, %v1969_v39  ;;  %v2969_v13 = vadd.f32 %v2968_v1, %v4178_v55 }
 0x2fd   : > { %v2967_v44 = vadd.f32 %v2966_v7, %v1971_v40  ;;  %v2972_v14 = vadd.f32 %v2971_v38, %v4181_v58 }
 0x2fe   : > { %v2691_v15 = vmul.f32 -1.442695, %v2964_v42  ;;  %v2970_v17 = vadd.f32 %v2969_v13, %v1973_v43 }
 0x2ff   : > { %v2707_v21 = vmul.f32 -1.442695, %v2967_v44  ;;  %v2973_v51 = vadd.f32 %v2972_v14, %v1975_v45  ;;  %v1519_v41 = vpop.f32.mrb[12].mxu0 }
 0x300   : > { %3295 = vpow2.f32 %v2691_v15  ;;  %v2692_v47 = vmul.f32 -1.442695, %v2970_v17  ;;  %v2974_v10 = vadd.f32 %v4172_v50, %v1519_v41  ;;  %v1521_v56 = vpop.f32.mrb[13].mxu0  ;;  %v4200_v60 = vpop.f32.mrb[28].mxu1 }
 0x301   : > { %3297 = vpow2.f32 %v2707_v21  ;;  %v2708_v22 = vmul.f32 -1.442695, %v2973_v51  ;;  %v2977_v39 = vadd.f32 %v4175_v19, %v1521_v56  ;;  %v1523_v28 = vpop.f32.mrb[14].mxu0  ;;  %v4203_v40 = vpop.f32.mrb[29].mxu1 }
 0x302   : > { %3299 = vpow2.f32 %v2692_v47  ;;  %v2980_v43 = vadd.f32 %v4172_v50, %v1523_v28  ;;  %v1525_v63 = vpop.f32.mrb[15].mxu0  ;;  %v2975_v45 = vadd.f32 %v2974_v10, %v4178_v55  ;;  %v4207_v1 = vpop.f32.mrb[30].mxu1 }
 0x303   : > { %v2983_v4 = vadd.f32 %v4175_v19, %v1525_v63  ;;  %v2978_v5 = vadd.f32 %v2977_v39, %v4181_v58  ;;  %v4211_v38 = vpop.f32.mrb[31].mxu1  ;;  %3301 = vpow2.f32 %v2708_v22 }
 0x304   : > { %v2976_v7 = vadd.f32 %v2975_v45, %v1979_v9  ;;  %v2981_v42 = vadd.f32 %v2980_v43, %v4178_v55 }
 0x305   : > { %v2979_v13 = vadd.f32 %v2978_v5, %v1981_v11  ;;  %v2984_v44 = vadd.f32 %v2983_v4, %v4181_v58 }
 0x306   : > { %v2693_v14 = vmul.f32 -1.442695, %v2976_v7  ;;  %v2982_v15 = vadd.f32 %v2981_v42, %v1983_v16 }
 0x307   : > { %v2709_v17 = vmul.f32 -1.442695, %v2979_v13  ;;  %v2985_v21 = vadd.f32 %v2984_v44, %v1985_v49  ;;  %v1529_v51 = vpop.f32.mrb[16].mxu0 }
 0x308   : > { %3303 = vpow2.f32 %v2693_v14  ;;  %v2694_v41 = vmul.f32 -1.442695, %v2982_v15  ;;  %v2986_v47 = vadd.f32 %v4172_v50, %v1529_v51  ;;  %v1531_v10 = vpop.f32.mrb[17].mxu0  ;;  %v4216_v56 = vpop.f32.mrb[32].mxu1 }
 0x309   : > { %3305 = vpow2.f32 %v2709_v17  ;;  %v2710_v22 = vmul.f32 -1.442695, %v2985_v21  ;;  %v2989_v9 = vadd.f32 %v4175_v19, %v1531_v10  ;;  %v1533_v39 = vpop.f32.mrb[18].mxu0  ;;  %v4219_v11 = vpop.f32.mrb[33].mxu1 }
 0x30a   : > { %v3296_v28 = vpop.eup %3295  ;;  %3307 = vpow2.f32 %v2694_v41  ;;  %v2992_v16 = vadd.f32 %v4172_v50, %v1533_v39  ;;  %v1535_v49 = vpop.f32.mrb[19].mxu0  ;;  %v2987_v43 = vadd.f32 %v2986_v47, %v4178_v55 }
 0x30b   : > { %v4223_v63 = vpop.f32.mrb[34].mxu1  ;;  %v3298_v45 = vpop.eup %3297  ;;  %v2193_v4 = vadd.f32 1.0, %v3296_v28  ;;  %v2995_v5 = vadd.f32 %v4175_v19, %v1535_v49  ;;  %v2990_v7 = vadd.f32 %v2989_v9, %v4181_v58  ;;  %3309 = vpow2.f32 %v2710_v22 }
 0x30c   : > { %v4227_v42 = vpop.f32.mrb[35].mxu1  ;;  %v3300_v13 = vpop.eup %3299  ;;  %v2305_v44 = vadd.f32 1.0, %v3298_v45  ;;  %v2988_v14 = vadd.f32 %v2987_v43, %v4184_v61  ;;  %v2993_v15 = vadd.f32 %v2992_v16, %v4178_v55 }
 0x30d   : > { %v2194_v17 = vadd.f32 1.0, %v3300_v13  ;;  %v2991_v21 = vadd.f32 %v2990_v7, %v4187_v0  ;;  %v2996_v51 = vadd.f32 %v2995_v5, %v4181_v58  ;;  %v3302_v41 = vpop.eup %3301  ;;  %3311 = vrcp.f32 %v2193_v4 }
 0x30e   : > { %v2695_v47 = vmul.f32 -1.442695, %v2988_v14  ;;  %v2994_v10 = vadd.f32 %v2993_v15, %v4191_v6  ;;  %3313 = vrcp.f32 %v2305_v44  ;;  %v2306_v0 = vadd.f32 1.0, %v3302_v41 }
 0x30f   : > { %v2711_v9 = vmul.f32 -1.442695, %v2991_v21  ;;  %v2997_v39 = vadd.f32 %v2996_v51, %v4195_v8  ;;  %v1539_v28 = vpop.f32.mrb[20].mxu0  ;;  %3315 = vrcp.f32 %v2194_v17 }
 0x310   : > { %v2696_v22 = vmul.f32 -1.442695, %v2994_v10  ;;  %v2998_v61 = vadd.f32 %v4172_v50, %v1539_v28  ;;  %v1541_v16 = vpop.f32.mrb[21].mxu0  ;;  %v4236_v49 = vpop.f32.mrb[36].mxu1  ;;  %3317 = vpow2.f32 %v2695_v47 }
 0x311   : > { %v2712_v43 = vmul.f32 -1.442695, %v2997_v39  ;;  %v3001_v45 = vadd.f32 %v4175_v19, %v1541_v16  ;;  %v1543_v4 = vpop.f32.mrb[22].mxu0  ;;  %v4239_v5 = vpop.f32.mrb[37].mxu1  ;;  %3319 = vpow2.f32 %v2711_v9 }
 0x312   : > { %v3304_v6 = vpop.eup %3303  ;;  %v2999_v8 = vadd.f32 %v2998_v61, %v4178_v55  ;;  %v3004_v7 = vadd.f32 %v4172_v50, %v1543_v4  ;;  %v1545_v13 = vpop.f32.mrb[23].mxu0  ;;  %3321 = vpow2.f32 %v2696_v22 }
 0x313   : > { %v4243_v44 = vpop.f32.mrb[38].mxu1  ;;  %v3306_v14 = vpop.eup %3305  ;;  %v2195_v15 = vadd.f32 1.0, %v3304_v6  ;;  %v3002_v17 = vadd.f32 %v3001_v45, %v4181_v58  ;;  %v3007_v21 = vadd.f32 %v4175_v19, %v1545_v13  ;;  %3323 = vpow2.f32 %v2712_v43 }
 0x314   : > { %v4247_v51 = vpop.f32.mrb[39].mxu1  ;;  %v3308_v41 = vpop.eup %3307  ;;  %v2307_v47 = vadd.f32 1.0, %v3306_v14  ;;  %v3000_v10 = vadd.f32 %v2999_v8, %v4200_v60  ;;  %v3005_v9 = vadd.f32 %v3004_v7, %v4178_v55  ;;  %3325 = vrcp.f32 %v2306_v0 }
 0x315   : > { %v2196_v39 = vadd.f32 1.0, %v3308_v41  ;;  %v3003_v28 = vadd.f32 %v3002_v17, %v4203_v40  ;;  %v3008_v61 = vadd.f32 %v3007_v21, %v4181_v58  ;;  %v3310_v22 = vpop.eup %3309  ;;  %3327 = vrcp.f32 %v2195_v15 }
 0x316   : > { %v2697_v16 = vmul.f32 -1.442695, %v3000_v10  ;;  %v3006_v45 = vadd.f32 %v3005_v9, %v4207_v1  ;;  %3329 = vrcp.f32 %v2307_v47  ;;  %v2308_v14 = vadd.f32 1.0, %v3310_v22 }
 0x317   : > { %v2713_v4 = vmul.f32 -1.442695, %v3003_v28  ;;  %v3009_v6 = vadd.f32 %v3008_v61, %v4211_v38  ;;  %v1549_v43 = vpop.f32.mrb[24].mxu0  ;;  %v4255_v13 = vpop.eup %3311  ;;  %3331 = vrcp.f32 %v2196_v39  ;;  %v1677_v28 = vsub.s32 2, %v4157_v46 }
 0x318   : > { %v2698_v60 = vmul.f32 -1.442695, %v3006_v45  ;;  %v3010_v0 = vadd.f32 %v4172_v50, %v1549_v43  ;;  %v1551_v8 = vpop.f32.mrb[25].mxu0  ;;  %v4258_v40 = vpop.f32.mrb[40].mxu1  ;;  %3333 = vpow2.f32 %v2697_v16 }
 0x319   : > { %4543 = vst [vmem:[#allocation9_spill] sm:$0xff] %v4258_v40  ;;  %v4260_v7 = vpop.eup %3313  ;;  %v2714_v15 = vmul.f32 -1.442695, %v3009_v6  ;;  %v1553_v1 = vpop.f32.mrb[26].mxu0  ;;  %3335 = vpow2.f32 %v2713_v4  ;;  %v3013_v41 = vadd.f32 %v4175_v19, %v1551_v8 }
 0x31a   : > { %v4262_v17 = vpop.f32.mrb[41].mxu1  ;;  %v4264_v21 = vpop.eup %3315  ;;  %v3011_v38 = vadd.f32 %v3010_v0, %v4178_v55  ;;  %v3016_v47 = vadd.f32 %v4172_v50, %v1553_v1  ;;  %3337 = vpow2.f32 %v2698_v60 }
 0x31b   : > { %v1555_v10 = vpop.f32.mrb[27].mxu0  ;;  %v4269_v9 = vpop.f32.mrb[42].mxu1  ;;  %3339 = vpow2.f32 %v2714_v15  ;;  %v3014_v6 = vadd.f32 %v3013_v41, %v4181_v58 }
 0x31c   : > { %4544 = vst [vmem:[#allocation10_spill] sm:$0xff] %v4269_v9  ;;  %v3318_v39 = vpop.eup %3317  ;;  %v3019_v61 = vadd.f32 %v4175_v19, %v1555_v10  ;;  %v4273_v22 = vpop.f32.mrb[43].mxu1  ;;  %v3012_v4 = vadd.f32 %v3011_v38, %v4216_v56  ;;  %3341 = vrcp.f32 %v2308_v14  ;;  %v3017_v8 = vadd.f32 %v3016_v47, %v4178_v55 }
 0x31d   : > { %4545 = vst [vmem:[#allocation11_spill] sm:$0xff] %v4273_v22  ;;  %v3320_v16 = vpop.eup %3319  ;;  %v2197_v45 = vadd.f32 1.0, %v3318_v39  ;;  %v3015_v25 = vadd.f32 %v3014_v6, %v4219_v11  ;;  %v4285_v47 = vrot.slane %v4164_v18, %v1677_v28  ;;  %v4288_v39 = vrot.slane %v4169_v48, %v1677_v28 }
 0x31e   : > { %v3322_v43 = vpop.eup %3321  ;;  %v2309_v0 = vadd.f32 1.0, %v3320_v16  ;;  %v3020_v1 = vadd.f32 %v3019_v61, %v4181_v58  ;;  %v2699_v10 = vmul.f32 -1.442695, %v3012_v4  ;;  %v3018_v56 = vadd.f32 %v3017_v8, %v4223_v63 }
 0x31f   : > { %v3324_v46 = vpop.eup %3323  ;;  %3343 = vrcp.f32 %v2197_v45  ;;  %v2198_v60 = vadd.f32 1.0, %v3322_v43  ;;  %v1559_v14 = vpop.f32.mrb[28].mxu0  ;;  %v2715_v61 = vmul.f32 -1.442695, %v3015_v25  ;;  %v4298_v18 = vadd.f32 %v4181_v58, %v4175_v19 }
 0x320   : > { %v4280_v9 = vpop.eup %3325  ;;  %3345 = vrcp.f32 %v2309_v0  ;;  %v2310_v15 = vadd.f32 1.0, %v3324_v46  ;;  %v3021_v38 = vadd.f32 %v3020_v1, %v4227_v42  ;;  %v1561_v16 = vpop.f32.mrb[29].mxu0  ;;  %v2700_v4 = vmul.f32 -1.442695, %v3018_v56 }
 0x321   : > { %v3328_v41 = vpop.eup %3327  ;;  %3347 = vrcp.f32 %v2198_v60  ;;  %v2904_v11 = vpop.f32.mrb[44].mxu1  ;;  %v4294_v42 = vadd.f32 %v4178_v55, %v4172_v50  ;;  %v1702_v25 = vadd.f32 %v4133_v53, %v4285_v47  ;;  %v3022_v43 = vadd.f32 %v4172_v50, %v1559_v14 }
 0x322   : > { %v4290_v45 = vpop.eup %3329  ;;  %3349 = vrcp.f32 %v2310_v15  ;;  %v1563_v6 = vpop.f32.mrb[30].mxu0  ;;  %v2716_v28 = vmul.f32 -1.442695, %v3021_v38  ;;  %v1696_v46 = vadd.f32 %v4285_v47, %v4135_v27  ;;  %v4309_v60 = vadd.f32 %v4137_v57, %v4285_v47 }
 0x323   : > { %v2078_v63 = vpop.f32.mrb[45].mxu1  ;;  %v4300_v48 = vpop.eup %3331  ;;  %3351 = vpow2.f32 %v2699_v10  ;;  %v3025_v15 = vadd.f32 %v4175_v19, %v1561_v16  ;;  %v3023_v10 = vadd.f32 %v3022_v43, %v4178_v55  ;;  %v2087_v38 = vadd.f32 %v2904_v11, %v4288_v39 }
 0x324   : > { %v1565_v0 = vpop.f32.mrb[31].mxu0  ;;  %v2905_v8 = vpop.f32.mrb[46].mxu1  ;;  %3353 = vpow2.f32 %v2715_v61  ;;  %v3028_v26 = vadd.f32 %v4172_v50, %v1563_v6  ;;  %v2079_v6 = vadd.f32 %v2078_v63, %v4288_v39  ;;  %v4338_v63 = vadd.f32 %v4141_v3, %v4285_v47 }
 0x325   : > { %v3334_v1 = vpop.eup %3333  ;;  %v2081_v56 = vpop.f32.mrb[47].mxu1  ;;  %3355 = vpow2.f32 %v2700_v4  ;;  %v3026_v27 = vadd.f32 %v3025_v15, %v4181_v58  ;;  %v3024_v16 = vadd.f32 %v3023_v10, %v4236_v49  ;;  %v2355_v12 = vmul.f32 %v3328_v41, %v2087_v38 }
 0x326   : > { %v3336_v23 = vpop.eup %3335  ;;  %v2199_v53 = vadd.f32 1.0, %v3334_v1  ;;  %3357 = vpow2.f32 %v2716_v28  ;;  %v3029_v11 = vadd.f32 %v3028_v26, %v4178_v55  ;;  %v4353_v3 = vadd.f32 %v4285_v47, %v4143_v30 }
 0x327   : > { %v3338_v14 = vpop.eup %3337  ;;  %v2311_v40 = vadd.f32 1.0, %v3336_v23  ;;  %v3027_v43 = vadd.f32 %v3026_v27, %v4239_v5  ;;  %v1949_v23 = vpop.f32.mrb[0].mxu0  ;;  %v2701_v1 = vmul.f32 -1.442695, %v3024_v16  ;;  %v2371_v50 = vadd.f32 %v2355_v12, %v1702_v25 }
 0x328   : > { %v3340_v57 = vpop.eup %3339  ;;  %3359 = vrcp.f32 %v2199_v53  ;;  %v2200_v61 = vadd.f32 1.0, %v3338_v14  ;;  %v1951_v15 = vpop.f32.mrb[1].mxu0  ;;  %v3031_v5 = vadd.f32 %v4175_v19, %v1565_v0  ;;  %v1699_v12 = vadd.f32 %v4285_v47, %v4139_v29 }
 0x329   : > { %v4317_v22 = vpop.eup %3341  ;;  %3361 = vrcp.f32 %v2311_v40  ;;  %v2312_v4 = vadd.f32 1.0, %v3340_v57  ;;  %v2908_v53 = vpop.f32.mrb[48].mxu1  ;;  %v2717_v41 = vmul.f32 -1.442695, %v3027_v43  ;;  %v3030_v40 = vadd.f32 %v3029_v11, %v4243_v44 }
 0x32a   : > { %v4321_v28 = vpop.eup %3343  ;;  %3363 = vrcp.f32 %v2200_v61  ;;  %v4328_v10 = vpop.f32.mrb[2].mxu0  ;;  %v2353_v25 = vmul.f32 %v4255_v13, %v2079_v6  ;;  %v3032_v14 = vadd.f32 %v3031_v5, %v4181_v58  ;;  %v2090_v27 = vadd.f32 %v2905_v8, %v4288_v39 }
 0x32b   : > { %v4324_v49 = vpop.eup %3345  ;;  %3365 = vrcp.f32 %v2312_v4  ;;  %v4330_v26 = vpop.f32.mrb[49].mxu1  ;;  %v2702_v0 = vmul.f32 -1.442695, %v3030_v40  ;;  %v4357_v13 = vadd.f32 %v4145_v31, %v4285_v47  ;;  %v2947_v30 = vadd.f32 %v4294_v42, %v1949_v23 }
 0x32c   : > { %v4332_v55 = vpop.eup %3347  ;;  %3367 = vpow2.f32 %v2701_v1  ;;  %v4341_v38 = vpop.f32.mrb[3].mxu0  ;;  %v2369_v61 = vadd.f32 %v2353_v25, %v1696_v46  ;;  %v3033_v58 = vadd.f32 %v3032_v14, %v4247_v51  ;;  %v2356_v8 = vmul.f32 %v4300_v48, %v2090_v27 }
 0x32d   : > { %v4343_v44 = vpop.f32.mrb[50].mxu1  ;;  %v4345_v19 = vpop.eup %3349  ;;  %3369 = vpow2.f32 %v2717_v41  ;;  %v2082_v1 = vadd.f32 %v2081_v56, %v4288_v39  ;;  %v4366_v51 = vadd.f32 %v4285_v47, %v4147_v32  ;;  %v2103_v32 = vadd.f32 %v2908_v53, %v4288_v39 }
 0x32e   : > { %v4349_v29 = vpop.f32.mrb[51].mxu1  ;;  %v3352_v57 = vpop.eup %3351  ;;  %3371 = vtanh.f32 %v2371_v50  ;;  %v2718_v41 = vmul.f32 -1.442695, %v3033_v58  ;;  %v2372_v46 = vadd.f32 %v2356_v8, %v4309_v60  ;;  %v2949_v60 = vadd.f32 %v4298_v18, %v1951_v15 }
 0x32f   : > { %v3354_v16 = vpop.eup %3353  ;;  %v2201_v4 = vadd.f32 1.0, %v3352_v57  ;;  %3373 = vpow2.f32 %v2702_v0  ;;  %v1959_v50 = vpop.f32.mrb[4].mxu0  ;;  %v2354_v5 = vmul.f32 %v4264_v21, %v2082_v1  ;;  %v4377_v0 = vadd.f32 %v4149_v34, %v4285_v47 }
 0x330   : > { %v3356_v43 = vpop.eup %3355  ;;  %v2313_v11 = vadd.f32 1.0, %v3354_v16  ;;  %3375 = vtanh.f32 %v2369_v61  ;;  %v4369_v25 = vpop.f32.mrb[5].mxu0  ;;  %v4385_v21 = vadd.f32 %v4285_v47, %v4151_v35  ;;  %v2687_v16 = vmul.f32 -1.442695, %v2947_v30 }
 0x331   : > { %v3358_v6 = vpop.eup %3357  ;;  %3377 = vrcp.f32 %v2201_v4  ;;  %v2202_v31 = vadd.f32 1.0, %v3356_v43  ;;  %v4371_v56 = vpop.f32.mrb[52].mxu1  ;;  %v2370_v61 = vadd.f32 %v2354_v5, %v1699_v12  ;;  %v2401_v15 = vsub.f32 1.0, %v4260_v7 }
 0x332   : > { %v3360_v40 = vpop.eup %3359  ;;  %3379 = vrcp.f32 %v2313_v11  ;;  %v2314_v48 = vadd.f32 1.0, %v3358_v6  ;;  %v1963_v14 = vpop.f32.mrb[6].mxu0  ;;  %v2433_v53 = vmul.f32 %v4260_v7, %v4019_v52  ;;  %v2403_v11 = vsub.f32 1.0, %v4290_v45 }
 0x333   : > { %v4373_v23 = vpop.eup %3361  ;;  %3381 = vrcp.f32 %v2202_v31  ;;  %v4381_v27 = vpop.f32.mrb[53].mxu1  ;;  %v2359_v8 = vmul.f32 %v3360_v40, %v2103_v32  ;;  %v2951_v12 = vadd.f32 %v4294_v42, %v4328_v10  ;;  %v2095_v1 = vadd.f32 %v4330_v26, %v4288_v39 }
 0x334   : > { %v3364_v57 = vpop.eup %3363  ;;  %3383 = vrcp.f32 %v2314_v48  ;;  %v4387_v4 = vpop.f32.mrb[7].mxu0  ;;  %v2703_v31 = vmul.f32 -1.442695, %v2949_v60  ;;  %v2953_v40 = vadd.f32 %v4298_v18, %v4341_v38  ;;  %v2435_v26 = vmul.f32 %v4290_v45, %v4040_v20 }
 0x335   : > { %v4389_v34 = vpop.f32.mrb[54].mxu1  ;;  %v4391_v58 = vpop.eup %3365  ;;  %3385 = vpow2.f32 %v2718_v41  ;;  %v2375_v52 = vadd.f32 %v2359_v8, %v4338_v63  ;;  %v2357_v41 = vmul.f32 %v4321_v28, %v2095_v1  ;;  %v2098_v5 = vadd.f32 %v4349_v29, %v4288_v39 }
 0x336   : > { %v4396_v43 = vpop.f32.mrb[55].mxu1  ;;  %v3368_v35 = vpop.eup %3367  ;;  %3387 = vtanh.f32 %v2372_v46  ;;  %v2106_v46 = vadd.f32 %v4343_v44, %v4288_v39  ;;  %v2688_v32 = vmul.f32 -1.442695, %v2951_v12  ;;  %v2704_v20 = vmul.f32 -1.442695, %v2953_v40 }
 0x337   : > { %v3370_v30 = vpop.eup %3369  ;;  %v2203_v6 = vadd.f32 1.0, %v3368_v35  ;;  %3389 = vtanh.f32 %v2370_v61  ;;  %v2373_v28 = vadd.f32 %v2357_v41, %v4353_v3  ;;  %v2358_v44 = vmul.f32 %v4332_v55, %v2098_v5 }
 0x338   : > { %v3372_v7 = vpop.eup %3371  ;;  %3391 = vpow2.f32 %v2687_v16  ;;  %v2360_v61 = vmul.f32 %v3364_v57, %v2106_v46  ;;  %v2955_v29 = vadd.f32 %v4294_v42, %v1959_v50  ;;  %v1723_v3 = vadd.f32 %v4285_v47, %v4155_v37 }
 0x339   : > { %v3374_v10 = vpop.eup %3373  ;;  %3393 = vrcp.f32 %v2203_v6  ;;  %v2419_v48 = vmul.f32 %v3372_v7, %v2403_v11  ;;  %v2402_v55 = vsub.f32 1.0, %v4280_v9  ;;  %v2434_v1 = vmul.f32 %v4280_v9, %v4022_v54 }
 0x33a   : > { %v3376_v63 = vpop.eup %3375  ;;  %v2204_v60 = vadd.f32 1.0, %v3374_v10  ;;  %3395 = vpow2.f32 %v2703_v31  ;;  %v2376_v45 = vadd.f32 %v2360_v61, %v4357_v13  ;;  %v2959_v13 = vadd.f32 %v4294_v42, %v1963_v14 }
 0x33b   : > { %v3378_v38 = vpop.eup %3377  ;;  %v2451_v16 = vadd.f32 %v2435_v26, %v2419_v48  ;;  %v2417_v8 = vmul.f32 %v3376_v63, %v2401_v15  ;;  %v2374_v15 = vadd.f32 %v2358_v44, %v4366_v51  ;;  %v2404_v6 = vsub.f32 1.0, %v4317_v22 }
 0x33c   : > { %v4415_v35 = vpop.eup %3379  ;;  %3397 = vrcp.f32 %v2204_v60  ;;  %v2436_v37 = vmul.f32 %v4317_v22, %v4043_v59  ;;  %v2689_v31 = vmul.f32 -1.442695, %v2955_v29  ;;  %v2111_v54 = vadd.f32 %v4381_v27, %v4288_v39 }
 0x33d   : > { %v3382_v11 = vpop.eup %3381  ;;  %2467 = vst [vmem:[%s3649_s30 + $0x30] sm:$0xff] %v2451_v16  ;;  %v2449_v57 = vadd.f32 %v2433_v53, %v2417_v8  ;;  %3399 = vtanh.f32 %v2375_v52  ;;  %v2315_v53 = vadd.f32 1.0, %v3370_v30  ;;  %v2119_v52 = vadd.f32 %v4371_v56, %v4288_v39 }
 0x33e   : > { %v4423_v12 = vpop.eup %3383  ;;  %3401 = vpow2.f32 %v2688_v32  ;;  %v2957_v7 = vadd.f32 %v4298_v18, %v4369_v25  ;;  %v2690_v30 = vmul.f32 -1.442695, %v2959_v13  ;;  %v2361_v41 = vmul.f32 %v3378_v38, %v2111_v54 }
 0x33f   : > { %v3386_v50 = vpop.eup %3385  ;;  %2465 = vst [vmem:[%s3649_s30 + $0x20] sm:$0xff] %v2449_v57  ;;  %3403 = vtanh.f32 %v2373_v28  ;;  %v2122_v40 = vadd.f32 %v4389_v34, %v4288_v39  ;;  %v2114_v27 = vadd.f32 %v4396_v43, %v4288_v39  ;;  %v2961_v34 = vadd.f32 %v4298_v18, %v4387_v4 }
 0x340   : > { %v3388_v51 = vpop.eup %3387  ;;  %3405 = vpow2.f32 %v2704_v20  ;;  %v2316_v42 = vadd.f32 1.0, %v3386_v50  ;;  %v2377_v25 = vadd.f32 %v2361_v41, %v4385_v21  ;;  %v2705_v63 = vmul.f32 -1.442695, %v2957_v7 }
 0x341   : > { %v3390_v9 = vpop.eup %3389  ;;  %v2420_v14 = vmul.f32 %v3388_v51, %v2404_v6  ;;  %3407 = vtanh.f32 %v2376_v45  ;;  %v2362_v60 = vmul.f32 %v3382_v11, %v2114_v27  ;;  %v1729_v28 = vadd.f32 %v4153_v36, %v4285_v47 }
 0x342   : > { %v3392_v59 = vpop.eup %3391  ;;  %v2418_v22 = vmul.f32 %v3390_v9, %v2402_v55  ;;  %3409 = vtanh.f32 %v2374_v15  ;;  %v2407_v61 = vsub.f32 1.0, %v4373_v23  ;;  %v2405_v21 = vsub.f32 1.0, %v4324_v49 }
 0x343   : > { %v3394_v46 = vpop.eup %3393  ;;  %v2452_v56 = vadd.f32 %v2436_v37, %v2420_v14  ;;  %v2189_v10 = vadd.f32 1.0, %v3392_v59  ;;  %3411 = vpow2.f32 %v2689_v31  ;;  %v2378_v8 = vadd.f32 %v2362_v60, %v1723_v3  ;;  %v3455_v37 = vld [vmem:[%s3644_s19 + $0x48] sm:$0xff]  ;;  %v3456_v60 = vld [vmem:[%s3644_s19 + $0x60] sm:$0xff] }
 0x344   : > { %v2450_v26 = vadd.f32 %v2434_v1, %v2418_v22  ;;  %v2363_v48 = vmul.f32 %v3394_v46, %v2119_v52  ;;  %v3396_v5 = vpop.eup %3395  ;;  %v2437_v18 = vmul.f32 %v4324_v49, %v4062_v62  ;;  %v2439_v4 = vmul.f32 %v4373_v23, %v4079_v33 }
 0x345   : > { %2468 = vst [vmem:[%s3649_s30 + $0x38] sm:$0xff] %v2452_v56  ;;  %3413 = vrcp.f32 %v2189_v10  ;;  %v2408_v57 = vsub.f32 1.0, %v4391_v58  ;;  %v2406_v49 = vsub.f32 1.0, %v4345_v19  ;;  %v2440_v33 = vmul.f32 %v4391_v58, %v4082_v2  ;;  %v4547_v56 = vld [vmem:[#allocation5_spill] sm:$0xff] }
 0x346   : > { %v3398_v32 = vpop.eup %3397  ;;  %3415 = vrcp.f32 %v2315_v53  ;;  %2466 = vst [vmem:[%s3649_s30 + $0x28] sm:$0xff] %v2450_v26  ;;  %v2379_v43 = vadd.f32 %v2363_v48, %v4377_v0  ;;  %v2706_v0 = vmul.f32 -1.442695, %v2961_v34  ;;  %v2301_v23 = vadd.f32 1.0, %v3396_v5 }
 0x347   : > { %v3400_v38 = vpop.eup %3399  ;;  %3417 = vpow2.f32 %v2690_v30  ;;  %v2364_v16 = vmul.f32 %v3398_v32, %v2122_v40  ;;  %v2063_v50 = vadd.f32 %v4262_v17, %v4288_v39  ;;  %v2438_v53 = vmul.f32 %v3455_v37, %v4345_v19  ;;  %v4546_v40 = vld [vmem:[#allocation11_spill] sm:$0xff] }
 0x348   : > { %v3402_v44 = vpop.eup %3401  ;;  %3419 = vrcp.f32 %v2316_v42  ;;  %v2423_v36 = vmul.f32 %v3400_v38, %v2407_v61  ;;  %v1684_v54 = vadd.f32 %v4285_v47, %v4127_v24  ;;  %v2066_v46 = vadd.f32 %v4546_v40, %v4288_v39 }
 0x349   : > { %v3404_v20 = vpop.eup %3403  ;;  %v2190_v45 = vadd.f32 1.0, %v3402_v44  ;;  %3421 = vpow2.f32 %v2705_v63  ;;  %v2380_v29 = vadd.f32 %v2364_v16, %v1729_v28  ;;  %v2409_v26 = vsub.f32 1.0, %v4415_v35 }
 0x34a   : > { %v3406_v11 = vpop.eup %3405  ;;  %v2455_v15 = vadd.f32 %v2439_v4, %v2423_v36  ;;  %v2421_v3 = vmul.f32 %v3404_v20, %v2405_v21  ;;  %3423 = vtanh.f32 %v2379_v43  ;;  %v2441_v32 = vmul.f32 %v3456_v60, %v4415_v35 }
 0x34b   : > { %v3408_v62 = vpop.eup %3407  ;;  %3425 = vrcp.f32 %v2190_v45  ;;  %v2302_v7 = vadd.f32 1.0, %v3406_v11 }
 0x34c   : > { %2471 = vst [vmem:[%s3649_s30 + $0x50] sm:$0xff] %v2455_v15  ;;  %v2453_v55 = vadd.f32 %v2437_v18, %v2421_v3  ;;  %v2424_v1 = vmul.f32 %v3408_v62, %v2408_v57  ;;  %3427 = vtanh.f32 %v2377_v25  ;;  %v3410_v13 = vpop.eup %3409  ;;  %v4548_v25 = vld [vmem:[#allocation8_spill] sm:$0xff] }
 0x34d   : > { %3429 = vpow2.f32 %v2706_v0  ;;  %v3412_v6 = vpop.eup %3411  ;;  %v2422_v31 = vmul.f32 %v3410_v13, %v2406_v49  ;;  %v1687_v5 = vadd.f32 %v4285_v47, %v4548_v25  ;;  %v3457_v18 = vld [vmem:[%s3644_s19 + $0x78] sm:$0xff]  ;;  %v3458_v0 = vld [vmem:[%s3644_s19 + $0x68] sm:$0xff] }
 0x34e   : > { %2469 = vst [vmem:[%s3649_s30 + $0x40] sm:$0xff] %v2453_v55  ;;  %v2456_v51 = vadd.f32 %v2440_v33, %v2424_v1  ;;  %3431 = vtanh.f32 %v2380_v29  ;;  %v2191_v58 = vadd.f32 1.0, %v3412_v6  ;;  %v2442_v35 = vmul.f32 %v3458_v0, %v4423_v12  ;;  %v4549_v29 = vld [vmem:[#allocation9_spill] sm:$0xff]  ;;  %v4550_v49 = vld [vmem:[#allocation6_spill] sm:$0xff] }
 0x34f   : > { %v3414_v2 = vpop.eup %3413  ;;  %3433 = vtanh.f32 %v2378_v8  ;;  %v2454_v17 = vadd.f32 %v2438_v53, %v2422_v31  ;;  %v2410_v8 = vsub.f32 1.0, %v4423_v12  ;;  %v2071_v11 = vadd.f32 %v4549_v29, %v4288_v39  ;;  %v4551_v13 = vld [vmem:[#allocation10_spill] sm:$0xff] }
 0x350   : > { %v3416_v52 = vpop.eup %3415  ;;  %v2349_v9 = vmul.f32 %v3414_v2, %v2063_v50  ;;  %3435 = vrcp.f32 %v2301_v23  ;;  %2472 = vst [vmem:[%s3649_s30 + $0x58] sm:$0xff] %v2456_v51  ;;  %v1690_v33 = vadd.f32 %v4550_v49, %v4285_v47  ;;  %v2074_v50 = vadd.f32 %v4551_v13, %v4288_v39  ;;  %v3459_v51 = vld [vmem:[%s3644_s19] sm:$0xff] }
 0x351   : > { %v3418_v42 = vpop.eup %3417  ;;  %3437 = vrcp.f32 %v2191_v58  ;;  %2470 = vst [vmem:[%s3649_s30 + $0x48] sm:$0xff] %v2454_v17  ;;  %v2411_v30 = vsub.f32 1.0, %v3416_v52  ;;  %v2443_v10 = vmul.f32 %v3416_v52, %v4547_v56  ;;  %v4552_v58 = vld [vmem:[#allocation7_spill] sm:$0xff] }
 0x352   : > { %v3420_v14 = vpop.eup %3419  ;;  %v2365_v19 = vadd.f32 %v2349_v9, %v1684_v54  ;;  %v2192_v59 = vadd.f32 1.0, %v3418_v42  ;;  %v1693_v52 = vadd.f32 %v4552_v58, %v4285_v47 }
 0x353   : > { %v3422_v22 = vpop.eup %3421  ;;  %v2412_v43 = vsub.f32 1.0, %v3420_v14  ;;  %v2444_v4 = vmul.f32 %v3457_v18, %v3420_v14 }
 0x354   : > { %v3424_v41 = vpop.eup %3423  ;;  %3439 = vtanh.f32 %v2365_v19  ;;  %v2303_v16 = vadd.f32 1.0, %v3422_v22  ;;  %v3460_v19 = vld [vmem:[%s3644_s19 + $0x8] sm:$0xff] }
 0x355   : > { %v3426_v24 = vpop.eup %3425  ;;  %3441 = vrcp.f32 %v2192_v59  ;;  %v2427_v27 = vmul.f32 %v3424_v41, %v2411_v30 }
 0x356   : > { %v3428_v48 = vpop.eup %3427  ;;  %v2350_v63 = vmul.f32 %v3426_v24, %v2066_v46  ;;  %3443 = vrcp.f32 %v2302_v7  ;;  %v3461_v46 = vld [vmem:[%s3644_s19 + $0x10] sm:$0xff] }
 0x357   : > { %v3430_v34 = vpop.eup %3429  ;;  %v2459_v28 = vadd.f32 %v2443_v10, %v2427_v27  ;;  %v2425_v61 = vmul.f32 %v3428_v48, %v2409_v26  ;;  %v3462_v48 = vld [vmem:[%s3644_s19 + $0x18] sm:$0xff] }
 0x358   : > { %v3432_v38 = vpop.eup %3431  ;;  %v2366_v21 = vadd.f32 %v2350_v63, %v1687_v5  ;;  %v2304_v3 = vadd.f32 1.0, %v3430_v34 }
 0x359   : > { %v3434_v44 = vpop.eup %3433  ;;  %2475 = vst [vmem:[%s3649_s30 + $0x70] sm:$0xff] %v2459_v28  ;;  %v2457_v36 = vadd.f32 %v2441_v32, %v2425_v61  ;;  %v2428_v20 = vmul.f32 %v3432_v38, %v2412_v43 }
 0x35a   : > { %v3436_v45 = vpop.eup %3435  ;;  %3445 = vtanh.f32 %v2366_v21  ;;  %v2426_v57 = vmul.f32 %v3434_v44, %v2410_v8 }
 0x35b   : > { %v3438_v15 = vpop.eup %3437  ;;  %2473 = vst [vmem:[%s3649_s30 + $0x60] sm:$0xff] %v2457_v36  ;;  %v2460_v62 = vadd.f32 %v2444_v4, %v2428_v20  ;;  %3447 = vrcp.f32 %v2303_v16  ;;  %v2397_v1 = vsub.f32 1.0, %v3436_v45  ;;  %v2429_v31 = vmul.f32 %v3459_v51, %v3436_v45 }
 0x35c   : > { %v2351_v23 = vmul.f32 %v3438_v15, %v2071_v11  ;;  %v2458_v55 = vadd.f32 %v2442_v35, %v2426_v57  ;;  %3449 = vrcp.f32 %v2304_v3 }
 0x35d   : > { %2476 = vst [vmem:[%s3649_s30 + $0x78] sm:$0xff] %v2460_v62 }
 0x35e   : > { %v3440_v12 = vpop.eup %3439  ;;  %v2367_v6 = vadd.f32 %v2351_v23, %v1690_v33  ;;  %2474 = vst [vmem:[%s3649_s30 + $0x68] sm:$0xff] %v2458_v55 }
 0x35f   : > { %v3442_v37 = vpop.eup %3441  ;;  %v2413_v53 = vmul.f32 %v3440_v12, %v2397_v1 }
 0x360   : > { %v3444_v2 = vpop.eup %3443  ;;  %3451 = vtanh.f32 %v2367_v6  ;;  %v2352_v54 = vmul.f32 %v3442_v37, %v2074_v50 }
 0x361   : > { %v2445_v9 = vadd.f32 %v2429_v31, %v2413_v53  ;;  %v2398_v39 = vsub.f32 1.0, %v3444_v2  ;;  %v2430_v7 = vmul.f32 %v3460_v19, %v3444_v2 }
 0x362   : > { %v2368_v17 = vadd.f32 %v2352_v54, %v1693_v52 }
 0x363   : > { %2461 = vst [vmem:[%s3649_s30] sm:$0xff] %v2445_v9 }
 0x364   : > { %v3446_v42 = vpop.eup %3445  ;;  %3453 = vtanh.f32 %v2368_v17 }
 0x365   : > { %v2414_v14 = vmul.f32 %v3446_v42, %v2398_v39  ;;  %v3448_v59 = vpop.eup %3447 }
 0x366   : > { %v3450_v30 = vpop.eup %3449  ;;  %v2399_v47 = vsub.f32 1.0, %v3448_v59  ;;  %v2431_v24 = vmul.f32 %v3461_v46, %v3448_v59 }
 0x367   : > { %v2446_v22 = vadd.f32 %v2430_v7, %v2414_v14  ;;  %v2400_v10 = vsub.f32 1.0, %v3450_v30  ;;  %v2432_v25 = vmul.f32 %v3462_v48, %v3450_v30 }
 0x369   : > { %2462 = vst [vmem:[%s3649_s30 + $0x8] sm:$0xff] %v2446_v22 }
 0x36a   : > { %v3452_v41 = vpop.eup %3451 }
 0x36b   : > { %v2415_v40 = vmul.f32 %v3452_v41, %v2399_v47 }
 0x36d   : > { %v2447_v56 = vadd.f32 %v2431_v24, %v2415_v40 }
 0x36e   : > { %v3454_v27 = vpop.eup %3453 }
 0x36f   : > { %2463 = vst [vmem:[%s3649_s30 + $0x10] sm:$0xff] %v2447_v56  ;;  %v2416_v26 = vmul.f32 %v3454_v27, %v2400_v10 }
 0x371   : > { %v2448_v5 = vadd.f32 %v2432_v25, %v2416_v26 }
 0x373   : > { %2464 = vst [vmem:[%s3649_s30 + $0x18] sm:$0xff] %v2448_v5 }
 0x374 PF: > { %s19_s15 = sadd.s32 1, %s3517_s15   ;;  %s4553_s27 = sld [smem:[#allocation4_spill]] }
 0x375   : > { %p16_p13 = scmp.ge.s32.totalorder %s19_s15, 6   ;;  %s4554_s30 = smov %s3497_s10 }
 0x376   : > { %s4555_s10 = smov %s3623_s22  ;;  %s4556_s11 = smov %s3509_s13 }
 0x377   : > { %s4557_s12 = smov %s3513_s14  ;;  %s4558_s13 = smov %s4561_s16 }
 0x378   :  { %18 = sbr.rel (!%p16_p13) target bundleno = 6 (0x6), region = 144 }
 0x37a   : > { %s4559_s14 = smov %s4553_s27 }

</bundles_post_ra>
